<compile_context>
chip_gen: v5e
topology: v5e:2x2
jax: 0.10.0
libtpu: 0.0.40
codegen_flags: <defaults>
</compile_context>

<pallas_src>
import functools

import jax
import jax.numpy as jnp
from jax import lax
from jax.experimental import pallas as pl
from jax.experimental.pallas import tpu as pltpu

_CONV_SIZES = (32, 64)
_KERNEL_SIZES = (3, 3)
_DENSE_SIZES = (100, 100)
_LANE = 128

_VMEM = pl.BlockSpec(memory_space=pltpu.MemorySpace.VMEM)


# ---------------------------------------------------------------------------
# Static shape bookkeeping
# ---------------------------------------------------------------------------
def calc_dense_n_inputs(input_img_height,
                        conv_layer_sizes=_CONV_SIZES,
                        conv_kernel_sizes=_KERNEL_SIZES):
    final = input_img_height
    for k in conv_kernel_sizes:
        final = final - (k - 1)          # VALID conv, stride 1
        final = (final - 2) // 2 + 1     # maxpool k=2, stride 2
    return int(conv_layer_sizes[-1] * final * final)


def _derived_dims(n_batch, img_h):
    """Row-layout constants for the fused kernel."""
    p1 = (img_h - 2) // 2          # pooled spatial after conv0/pool0 (16 -> 7)
    p2 = (p1 - 2) // 2             # pooled spatial after conv1/pool1 (7 -> 2)
    blk = n_batch * p1 * p1        # rows per pool0 corner block / pooled map rows
    # highest pooled-conv1 row we extract: r = n*p1^2 + 2*ph*p1 + 2*pw
    base_max = (n_batch - 1) * p1 * p1 + 2 * (p2 - 1) * (p1 + 1)
    rows_v = base_max + 1          # rows of the pool1 value we compute
    rows_c1 = base_max + p1 + 2    # rows of the conv1 value we compute
    # shift-trick reads stay inside the pooled map:
    assert rows_c1 - 1 + 2 * (p1 + 1) <= blk - 1
    return p1, p2, blk, rows_v, rows_c1


# ---------------------------------------------------------------------------
# The fused kernel
# ---------------------------------------------------------------------------
def _make_fused_kernel(n_batch, img_h, n_classes):
    p1, p2, blk, rows_v, rows_c1 = _derived_dims(n_batch, img_h)
    c0, c1 = _CONV_SIZES

    def kernel(a0_ref, w0_ref, b0_ref, w1_ref, b1_ref,
               wd0_ref, bd0_ref, wd1_ref, bd1_ref, wd2_ref, bd2_ref,
               out_ref, p0_ref, c1_ref, v_ref, flat_ref):
        f32 = jnp.float32

        # ---- conv0 + maxpool(2) + relu ------------------------------------
        # a0 rows are pre-grouped into the four 2x2-window corners, so the
        # max-pool is an elementwise max of four corner-block matmuls.
        def corner(b):
            return jnp.dot(a0_ref[pl.ds(b * blk, blk), :], w0_ref[...],
                           preferred_element_type=f32)

        pooled = jnp.maximum(jnp.maximum(corner(0), corner(1)),
                             jnp.maximum(corner(2), corner(3)))
        p0_ref[...] = jnp.maximum(pooled + b0_ref[...], 0.0)   # (blk, 32)

        # ---- conv1 (3x3) as 9 row-shifted matmuls (no im2col) -------------
        # pooled-map row layout is n*p1*p1 + h*p1 + w, so tap (kh, kw) is a
        # row shift of kh*p1 + kw.  Out-of-window rows are junk but are never
        # read by the pooling/extraction below.
        acc = jnp.dot(p0_ref[pl.ds(0, rows_c1), :], w1_ref[pl.ds(0, c0), :],
                      preferred_element_type=f32) + b1_ref[...]
        for t in range(1, 9):
            shift = (t // 3) * p1 + (t % 3)
            acc = acc + jnp.dot(p0_ref[pl.ds(shift, rows_c1), :],
                                w1_ref[pl.ds(t * c0, c0), :],
                                preferred_element_type=f32)
        c1_ref[...] = acc                                       # (rows_c1, 64)

        # ---- maxpool(2) + relu --------------------------------------------
        v = jnp.maximum(
            jnp.maximum(c1_ref[pl.ds(0, rows_v), :],
                        c1_ref[pl.ds(1, rows_v), :]),
            jnp.maximum(c1_ref[pl.ds(p1, rows_v), :],
                        c1_ref[pl.ds(p1 + 1, rows_v), :]))
        v_ref[...] = jnp.maximum(v, 0.0)

        # ---- flatten into a lane-aligned (n_batch, p2*p2*128) scratch ------
        # (dense0's weights were permuted at pack time to this (H, W, C) order,
        #  so no NHWC->NCHW transpose is needed anywhere.)
        flat_ref[...] = jnp.zeros_like(flat_ref)
        for n in range(n_batch):
            for ph in range(p2):
                for pw in range(p2):
                    r = n * p1 * p1 + 2 * ph * p1 + 2 * pw
                    k = ph * p2 + pw
                    flat_ref[pl.ds(n, 1), pl.ds(k * _LANE, c1)] = \
                        v_ref[pl.ds(r, 1), :]

        # ---- dense chain (widths zero-padded to 128) + softmax -------------
        h = jnp.maximum(jnp.dot(flat_ref[...], wd0_ref[...],
                                preferred_element_type=f32) + bd0_ref[...], 0.0)
        h = jnp.maximum(jnp.dot(h, wd1_ref[...],
                                preferred_element_type=f32) + bd1_ref[...], 0.0)
        h = jnp.maximum(jnp.dot(h, wd2_ref[...],
                                preferred_element_type=f32) + bd2_ref[...], 0.0)

        logits = h[:, :n_classes]           # drop the zero-padded lanes
        m = jnp.max(logits, axis=-1, keepdims=True)
        e = jnp.exp(logits - m)
        s = jnp.sum(e, axis=-1, keepdims=True)
        # TODO(synk): approx=True would use the (idle) EUP slot; exact kept so
        # probabilities sum to 1 to float32 accuracy.
        out_ref[...] = e * pl.reciprocal(s, approx=False)

    return kernel


# ---------------------------------------------------------------------------
# Host-side glue: input im2col (corner-grouped rows) and the pallas_call
# ---------------------------------------------------------------------------
def _im2col_corner_grouped(x_nchw, k=3):
    """im2col for conv0, rows ordered (corner_i, corner_j, n, ph, pw)."""
    x = jnp.transpose(x_nchw, (0, 2, 3, 1)).astype(jnp.float32)   # NHWC
    n, h, w, cin = x.shape
    ho, wo = h - k + 1, w - k + 1
    cols = jnp.concatenate(
        [x[:, kh:kh + ho, kw:kw + wo, :] for kh in range(k) for kw in range(k)],
        axis=-1)                                                  # (n,ho,wo,k*k*cin)
    p1h, p1w = ho // 2, wo // 2
    cols = cols.reshape(n, p1h, 2, p1w, 2, k * k * cin)
    cols = jnp.transpose(cols, (2, 4, 0, 1, 3, 5))                # (i,j,n,ph,pw,:)
    return cols.reshape(4 * n * p1h * p1w, k * k * cin)


@jax.jit
def clay_classifier_forward(x_nchw, kparams):
    n_batch, _, img_h, _ = x_nchw.shape
    p1, p2, blk, rows_v, rows_c1 = _derived_dims(n_batch, img_h)
    c0, c1 = _CONV_SIZES
    n_classes = _DENSE_SIZES[0]

    a0 = _im2col_corner_grouped(x_nchw)        # tiny; input-side only

    return pl.pallas_call(
        _make_fused_kernel(n_batch, img_h, n_classes),
        out_shape=jax.ShapeDtypeStruct((n_batch, n_classes), jnp.float32),
        in_specs=[_VMEM] * 11,
        out_specs=_VMEM,
        scratch_shapes=[
            pltpu.VMEM((blk, c0), jnp.float32),                  # pooled conv0 map
            pltpu.VMEM((rows_c1, c1), jnp.float32),              # conv1 rows
            pltpu.VMEM((rows_v, c1), jnp.float32),               # pooled conv1 rows
            pltpu.VMEM((n_batch, p2 * p2 * _LANE), jnp.float32),  # flat dense input
        ],
    )(a0,
      kparams["w0"], kparams["b0"], kparams["w1"], kparams["b1"],
      kparams["wd0"], kparams["bd0"], kparams["wd1"], kparams["bd1"],
      kparams["wd2"], kparams["bd2"])


# ---------------------------------------------------------------------------
# Parameters: canonical (PyTorch-layout) init + one-time kernel packing
# ---------------------------------------------------------------------------
def init_params(key, n_input_channels, input_img_height):
    """PyTorch-default-style init (U(-1/sqrt(fan_in), +)), canonical layouts:
    conv weights OIHW, dense weights (out, in)."""
    def uniform(k, shape, fan_in):
        bound = 1.0 / (fan_in ** 0.5)
        return jax.random.uniform(k, shape, jnp.float32, -bound, bound)

    keys = iter(jax.random.split(key, 16))
    p = {}
    cin = n_input_channels
    for i, (cout, ks) in enumerate(zip(_CONV_SIZES, _KERNEL_SIZES)):
        fan_in = cin * ks * ks
        p[f"conv{i}_w"] = uniform(next(keys), (cout, cin, ks, ks), fan_in)
        p[f"conv{i}_b"] = uniform(next(keys), (cout,), fan_in)
        cin = cout

    d_in = calc_dense_n_inputs(input_img_height)
    in_sizes = [d_in] + list(_DENSE_SIZES)
    out_sizes = [_DENSE_SIZES[0]] + list(_DENSE_SIZES)
    for i, (di, do) in enumerate(zip(in_sizes, out_sizes)):
        p[f"dense{i}_w"] = uniform(next(keys), (do, di), di)
        p[f"dense{i}_b"] = uniform(next(keys), (do,), di)
    # TODO(synk): the reference module also builds `self.output = Linear(100, 1)`
    # but never uses it in forward(); it is intentionally omitted.
    return p


def pack_params(p, input_img_height):
    """One-time re-layout: conv weights as im2col matrices, dense weights
    transposed, dense0 rows permuted to the kernel's (H, W, C) flatten order,
    and dense widths zero-padded to 128 lanes (numerically exact)."""
    c0, c1 = _CONV_SIZES
    n_cls = _DENSE_SIZES[0]
    p1 = (input_img_height - 2) // 2
    p2 = (p1 - 2) // 2
    k = {}

    w0 = jnp.transpose(p["conv0_w"], (2, 3, 1, 0))      # (kh, kw, cin, cout)
    k["w0"] = w0.reshape(-1, c0)                        # rows = (kh*3+kw)*cin + c
    k["b0"] = p["conv0_b"].reshape(1, c0)
    w1 = jnp.transpose(p["conv1_w"], (2, 3, 1, 0))      # (3, 3, 32, 64)
    k["w1"] = w1.reshape(-1, c1)                        # rows = (kh*3+kw)*32 + c
    k["b1"] = p["conv1_b"].reshape(1, c1)

    # dense0: torch flatten order is (C, H, W); regroup rows to the kernel's
    # lane-aligned chunk*128 + C order, pad out-dim to 128.
    wd0 = p["dense0_w"].T                               # (C*H*W, 100)
    wd0 = wd0.reshape(c1, p2, p2, n_cls)                # (c, ph, pw, out)
    wd0 = jnp.transpose(wd0, (1, 2, 0, 3)).reshape(p2 * p2, c1, n_cls)
    wd0 = jnp.pad(wd0, ((0, 0), (0, _LANE - c1), (0, _LANE - n_cls)))
    k["wd0"] = wd0.reshape(p2 * p2 * _LANE, _LANE)
    k["bd0"] = jnp.pad(p["dense0_b"], (0, _LANE - n_cls)).reshape(1, _LANE)
    for i in (1, 2):
        w = p[f"dense{i}_w"].T                          # (in, out)
        k[f"wd{i}"] = jnp.pad(w, ((0, _LANE - n_cls), (0, _LANE - n_cls)))
        k[f"bd{i}"] = jnp.pad(p[f"dense{i}_b"], (0, _LANE - n_cls)).reshape(1, _LANE)
    return jax.tree_util.tree_map(lambda a: jnp.asarray(a, jnp.float32), k)


# ---------------------------------------------------------------------------
# Pure-JAX reference (mirrors the PyTorch forward, Dropout = eval identity)
# ---------------------------------------------------------------------------
def reference_forward(x_nchw, p):
    def conv(x, w, b):
        y = lax.conv_general_dilated(x, w, (1, 1), "VALID",
                                     dimension_numbers=("NCHW", "OIHW", "NCHW"))
        return y + b[None, :, None, None]

    def pool_relu(x):
        n, c, h, w = x.shape
        x = x[:, :, :(h // 2) * 2, :(w // 2) * 2]
        x = x.reshape(n, c, h // 2, 2, w // 2, 2).max(axis=(3, 5))
        return jnp.maximum(x, 0.0)

    y = pool_relu(conv(x_nchw, p["conv0_w"], p["conv0_b"]))
    y = pool_relu(conv(y, p["conv1_w"], p["conv1_b"]))
    y = y.reshape(y.shape[0], -1)                        # (C, H, W) flatten
    for i in range(3):
        y = jnp.maximum(y @ p[f"dense{i}_w"].T + p[f"dense{i}_b"], 0.0)
    return jax.nn.softmax(y, axis=-1)


if __name__ == "__main__":
    batch, cin, img_h = 2, 4, 16
    key = jax.random.PRNGKey(0)
    kx, kp = jax.random.split(key)
    x = jax.random.normal(kx, (batch, cin, img_h, img_h), jnp.float32)

    params = init_params(kp, cin, img_h)
    kparams = pack_params(params, img_h)

    out = clay_classifier_forward(x, kparams)
    out = jax.block_until_ready(out)

    ref = reference_forward(x, params)

    assert out.shape == (batch, _DENSE_SIZES[0]), out.shape
    assert jnp.allclose(jnp.sum(out, axis=-1), 1.0, atol=1e-5)
    assert jnp.allclose(out, ref, atol=1e-3), float(jnp.max(jnp.abs(out - ref)))
    print("KERNEL_OK")
</pallas_src>

<mosaic_0001>
module attributes {stable_mosaic.version = 11 : i64} {
  func.func @kernel(%arg0: memref<392x36xf32, #tpu.memory_space<vmem>>, %arg1: memref<36x32xf32, #tpu.memory_space<vmem>>, %arg2: memref<1x32xf32, #tpu.memory_space<vmem>>, %arg3: memref<288x64xf32, #tpu.memory_space<vmem>>, %arg4: memref<1x64xf32, #tpu.memory_space<vmem>>, %arg5: memref<512x128xf32, #tpu.memory_space<vmem>>, %arg6: memref<1x128xf32, #tpu.memory_space<vmem>>, %arg7: memref<128x128xf32, #tpu.memory_space<vmem>>, %arg8: memref<1x128xf32, #tpu.memory_space<vmem>>, %arg9: memref<128x128xf32, #tpu.memory_space<vmem>>, %arg10: memref<1x128xf32, #tpu.memory_space<vmem>>, %arg11: memref<2x100xf32, #tpu.memory_space<vmem>>, %arg12: memref<98x32xf32, #tpu.memory_space<vmem>>, %arg13: memref<74x64xf32, #tpu.memory_space<vmem>>, %arg14: memref<66x64xf32, #tpu.memory_space<vmem>>, %arg15: memref<2x512xf32, #tpu.memory_space<vmem>>) attributes {dimension_semantics = [], scalar_prefetch = 0 : i64, scratch_operands = 4 : i64, tpu.core_type = #tpu.core_type<tc>} {
    %c0 = arith.constant 0 : index
    %c0_0 = arith.constant 0 : index
    %0 = vector.load %arg0[%c0, %c0_0] : memref<392x36xf32, #tpu.memory_space<vmem>>, vector<98x36xf32>
    %c0_1 = arith.constant 0 : index
    %c0_2 = arith.constant 0 : index
    %1 = vector.load %arg1[%c0_1, %c0_2] : memref<36x32xf32, #tpu.memory_space<vmem>>, vector<36x32xf32>
    %cst = arith.constant dense<0.000000e+00> : vector<98x32xf32>
    %2 = tpu.matmul %0, %1, %cst {dimension_numbers = #tpu.dot_dimension_numbers<[1], [0], [0], [1], [0, 0, 1, 1], [], []>} : vector<98x36xf32>, vector<36x32xf32>, vector<98x32xf32> -> vector<98x32xf32>
    %c98 = arith.constant 98 : index
    %c0_3 = arith.constant 0 : index
    %3 = vector.load %arg0[%c98, %c0_3] : memref<392x36xf32, #tpu.memory_space<vmem>>, vector<98x36xf32>
    %c0_4 = arith.constant 0 : index
    %c0_5 = arith.constant 0 : index
    %4 = vector.load %arg1[%c0_4, %c0_5] : memref<36x32xf32, #tpu.memory_space<vmem>>, vector<36x32xf32>
    %cst_6 = arith.constant dense<0.000000e+00> : vector<98x32xf32>
    %5 = tpu.matmul %3, %4, %cst_6 {dimension_numbers = #tpu.dot_dimension_numbers<[1], [0], [0], [1], [0, 0, 1, 1], [], []>} : vector<98x36xf32>, vector<36x32xf32>, vector<98x32xf32> -> vector<98x32xf32>
    %6 = arith.maximumf %2, %5 : vector<98x32xf32>
    %c196 = arith.constant 196 : index
    %c0_7 = arith.constant 0 : index
    %7 = vector.load %arg0[%c196, %c0_7] : memref<392x36xf32, #tpu.memory_space<vmem>>, vector<98x36xf32>
    %c0_8 = arith.constant 0 : index
    %c0_9 = arith.constant 0 : index
    %8 = vector.load %arg1[%c0_8, %c0_9] : memref<36x32xf32, #tpu.memory_space<vmem>>, vector<36x32xf32>
    %cst_10 = arith.constant dense<0.000000e+00> : vector<98x32xf32>
    %9 = tpu.matmul %7, %8, %cst_10 {dimension_numbers = #tpu.dot_dimension_numbers<[1], [0], [0], [1], [0, 0, 1, 1], [], []>} : vector<98x36xf32>, vector<36x32xf32>, vector<98x32xf32> -> vector<98x32xf32>
    %c294 = arith.constant 294 : index
    %c0_11 = arith.constant 0 : index
    %10 = vector.load %arg0[%c294, %c0_11] : memref<392x36xf32, #tpu.memory_space<vmem>>, vector<98x36xf32>
    %c0_12 = arith.constant 0 : index
    %c0_13 = arith.constant 0 : index
    %11 = vector.load %arg1[%c0_12, %c0_13] : memref<36x32xf32, #tpu.memory_space<vmem>>, vector<36x32xf32>
    %cst_14 = arith.constant dense<0.000000e+00> : vector<98x32xf32>
    %12 = tpu.matmul %10, %11, %cst_14 {dimension_numbers = #tpu.dot_dimension_numbers<[1], [0], [0], [1], [0, 0, 1, 1], [], []>} : vector<98x36xf32>, vector<36x32xf32>, vector<98x32xf32> -> vector<98x32xf32>
    %13 = arith.maximumf %9, %12 : vector<98x32xf32>
    %14 = arith.maximumf %6, %13 : vector<98x32xf32>
    %c0_15 = arith.constant 0 : index
    %c0_16 = arith.constant 0 : index
    %15 = vector.load %arg2[%c0_15, %c0_16] : memref<1x32xf32, #tpu.memory_space<vmem>>, vector<1x32xf32>
    %16 = vector.broadcast %15 : vector<1x32xf32> to vector<98x32xf32>
    %17 = arith.addf %14, %16 : vector<98x32xf32>
    %cst_17 = arith.constant 0.000000e+00 : f32
    %18 = vector.broadcast %cst_17 : f32 to vector<98x32xf32>
    %19 = arith.maximumf %17, %18 : vector<98x32xf32>
    %c0_18 = arith.constant 0 : index
    %c0_19 = arith.constant 0 : index
    %20 = vector.load %arg12[%c0_18, %c0_19] : memref<98x32xf32, #tpu.memory_space<vmem>>, vector<98x32xf32>
    tpu.vector_store %arg12[%c0_18, %c0_19], %19 {strides = array<i32>} : memref<98x32xf32, #tpu.memory_space<vmem>>, vector<98x32xf32>,
    %c0_20 = arith.constant 0 : index
    %c0_21 = arith.constant 0 : index
    %21 = vector.load %arg12[%c0_20, %c0_21] : memref<98x32xf32, #tpu.memory_space<vmem>>, vector<74x32xf32>
    %c0_22 = arith.constant 0 : index
    %c0_23 = arith.constant 0 : index
    %22 = vector.load %arg3[%c0_22, %c0_23] : memref<288x64xf32, #tpu.memory_space<vmem>>, vector<32x64xf32>
    %cst_24 = arith.constant dense<0.000000e+00> : vector<74x64xf32>
    %23 = tpu.matmul %21, %22, %cst_24 {dimension_numbers = #tpu.dot_dimension_numbers<[1], [0], [0], [1], [0, 0, 1, 1], [], []>} : vector<74x32xf32>, vector<32x64xf32>, vector<74x64xf32> -> vector<74x64xf32>
    %c0_25 = arith.constant 0 : index
    %c0_26 = arith.constant 0 : index
    %24 = vector.load %arg4[%c0_25, %c0_26] : memref<1x64xf32, #tpu.memory_space<vmem>>, vector<1x64xf32>
    %25 = vector.broadcast %24 : vector<1x64xf32> to vector<74x64xf32>
    %26 = arith.addf %23, %25 : vector<74x64xf32>
    %c1 = arith.constant 1 : index
    %c0_27 = arith.constant 0 : index
    %27 = vector.load %arg12[%c1, %c0_27] : memref<98x32xf32, #tpu.memory_space<vmem>>, vector<74x32xf32>
    %c32 = arith.constant 32 : index
    %c0_28 = arith.constant 0 : index
    %28 = vector.load %arg3[%c32, %c0_28] : memref<288x64xf32, #tpu.memory_space<vmem>>, vector<32x64xf32>
    %cst_29 = arith.constant dense<0.000000e+00> : vector<74x64xf32>
    %29 = tpu.matmul %27, %28, %cst_29 {dimension_numbers = #tpu.dot_dimension_numbers<[1], [0], [0], [1], [0, 0, 1, 1], [], []>} : vector<74x32xf32>, vector<32x64xf32>, vector<74x64xf32> -> vector<74x64xf32>
    %30 = arith.addf %26, %29 : vector<74x64xf32>
    %c2 = arith.constant 2 : index
    %c0_30 = arith.constant 0 : index
    %31 = vector.load %arg12[%c2, %c0_30] : memref<98x32xf32, #tpu.memory_space<vmem>>, vector<74x32xf32>
    %c64 = arith.constant 64 : index
    %c0_31 = arith.constant 0 : index
    %32 = vector.load %arg3[%c64, %c0_31] : memref<288x64xf32, #tpu.memory_space<vmem>>, vector<32x64xf32>
    %cst_32 = arith.constant dense<0.000000e+00> : vector<74x64xf32>
    %33 = tpu.matmul %31, %32, %cst_32 {dimension_numbers = #tpu.dot_dimension_numbers<[1], [0], [0], [1], [0, 0, 1, 1], [], []>} : vector<74x32xf32>, vector<32x64xf32>, vector<74x64xf32> -> vector<74x64xf32>
    %34 = arith.addf %30, %33 : vector<74x64xf32>
    %c7 = arith.constant 7 : index
    %c0_33 = arith.constant 0 : index
    %35 = vector.load %arg12[%c7, %c0_33] : memref<98x32xf32, #tpu.memory_space<vmem>>, vector<74x32xf32>
    %c96 = arith.constant 96 : index
    %c0_34 = arith.constant 0 : index
    %36 = vector.load %arg3[%c96, %c0_34] : memref<288x64xf32, #tpu.memory_space<vmem>>, vector<32x64xf32>
    %cst_35 = arith.constant dense<0.000000e+00> : vector<74x64xf32>
    %37 = tpu.matmul %35, %36, %cst_35 {dimension_numbers = #tpu.dot_dimension_numbers<[1], [0], [0], [1], [0, 0, 1, 1], [], []>} : vector<74x32xf32>, vector<32x64xf32>, vector<74x64xf32> -> vector<74x64xf32>
    %38 = arith.addf %34, %37 : vector<74x64xf32>
    %c8 = arith.constant 8 : index
    %c0_36 = arith.constant 0 : index
    %39 = vector.load %arg12[%c8, %c0_36] : memref<98x32xf32, #tpu.memory_space<vmem>>, vector<74x32xf32>
    %c128 = arith.constant 128 : index
    %c0_37 = arith.constant 0 : index
    %40 = vector.load %arg3[%c128, %c0_37] : memref<288x64xf32, #tpu.memory_space<vmem>>, vector<32x64xf32>
    %cst_38 = arith.constant dense<0.000000e+00> : vector<74x64xf32>
    %41 = tpu.matmul %39, %40, %cst_38 {dimension_numbers = #tpu.dot_dimension_numbers<[1], [0], [0], [1], [0, 0, 1, 1], [], []>} : vector<74x32xf32>, vector<32x64xf32>, vector<74x64xf32> -> vector<74x64xf32>
    %42 = arith.addf %38, %41 : vector<74x64xf32>
    %c9 = arith.constant 9 : index
    %c0_39 = arith.constant 0 : index
    %43 = vector.load %arg12[%c9, %c0_39] : memref<98x32xf32, #tpu.memory_space<vmem>>, vector<74x32xf32>
    %c160 = arith.constant 160 : index
    %c0_40 = arith.constant 0 : index
    %44 = vector.load %arg3[%c160, %c0_40] : memref<288x64xf32, #tpu.memory_space<vmem>>, vector<32x64xf32>
    %cst_41 = arith.constant dense<0.000000e+00> : vector<74x64xf32>
    %45 = tpu.matmul %43, %44, %cst_41 {dimension_numbers = #tpu.dot_dimension_numbers<[1], [0], [0], [1], [0, 0, 1, 1], [], []>} : vector<74x32xf32>, vector<32x64xf32>, vector<74x64xf32> -> vector<74x64xf32>
    %46 = arith.addf %42, %45 : vector<74x64xf32>
    %c14 = arith.constant 14 : index
    %c0_42 = arith.constant 0 : index
    %47 = vector.load %arg12[%c14, %c0_42] : memref<98x32xf32, #tpu.memory_space<vmem>>, vector<74x32xf32>
    %c192 = arith.constant 192 : index
    %c0_43 = arith.constant 0 : index
    %48 = vector.load %arg3[%c192, %c0_43] : memref<288x64xf32, #tpu.memory_space<vmem>>, vector<32x64xf32>
    %cst_44 = arith.constant dense<0.000000e+00> : vector<74x64xf32>
    %49 = tpu.matmul %47, %48, %cst_44 {dimension_numbers = #tpu.dot_dimension_numbers<[1], [0], [0], [1], [0, 0, 1, 1], [], []>} : vector<74x32xf32>, vector<32x64xf32>, vector<74x64xf32> -> vector<74x64xf32>
    %50 = arith.addf %46, %49 : vector<74x64xf32>
    %c15 = arith.constant 15 : index
    %c0_45 = arith.constant 0 : index
    %51 = vector.load %arg12[%c15, %c0_45] : memref<98x32xf32, #tpu.memory_space<vmem>>, vector<74x32xf32>
    %c224 = arith.constant 224 : index
    %c0_46 = arith.constant 0 : index
    %52 = vector.load %arg3[%c224, %c0_46] : memref<288x64xf32, #tpu.memory_space<vmem>>, vector<32x64xf32>
    %cst_47 = arith.constant dense<0.000000e+00> : vector<74x64xf32>
    %53 = tpu.matmul %51, %52, %cst_47 {dimension_numbers = #tpu.dot_dimension_numbers<[1], [0], [0], [1], [0, 0, 1, 1], [], []>} : vector<74x32xf32>, vector<32x64xf32>, vector<74x64xf32> -> vector<74x64xf32>
    %54 = arith.addf %50, %53 : vector<74x64xf32>
    %c16 = arith.constant 16 : index
    %c0_48 = arith.constant 0 : index
    %55 = vector.load %arg12[%c16, %c0_48] : memref<98x32xf32, #tpu.memory_space<vmem>>, vector<74x32xf32>
    %c256 = arith.constant 256 : index
    %c0_49 = arith.constant 0 : index
    %56 = vector.load %arg3[%c256, %c0_49] : memref<288x64xf32, #tpu.memory_space<vmem>>, vector<32x64xf32>
    %cst_50 = arith.constant dense<0.000000e+00> : vector<74x64xf32>
    %57 = tpu.matmul %55, %56, %cst_50 {dimension_numbers = #tpu.dot_dimension_numbers<[1], [0], [0], [1], [0, 0, 1, 1], [], []>} : vector<74x32xf32>, vector<32x64xf32>, vector<74x64xf32> -> vector<74x64xf32>
    %58 = arith.addf %54, %57 : vector<74x64xf32>
    %c0_51 = arith.constant 0 : index
    %c0_52 = arith.constant 0 : index
    %59 = vector.load %arg13[%c0_51, %c0_52] : memref<74x64xf32, #tpu.memory_space<vmem>>, vector<74x64xf32>
    tpu.vector_store %arg13[%c0_51, %c0_52], %58 {strides = array<i32>} : memref<74x64xf32, #tpu.memory_space<vmem>>, vector<74x64xf32>,
    %c0_53 = arith.constant 0 : index
    %c0_54 = arith.constant 0 : index
    %60 = vector.load %arg13[%c0_53, %c0_54] : memref<74x64xf32, #tpu.memory_space<vmem>>, vector<66x64xf32>
    %c1_55 = arith.constant 1 : index
    %c0_56 = arith.constant 0 : index
    %61 = vector.load %arg13[%c1_55, %c0_56] : memref<74x64xf32, #tpu.memory_space<vmem>>, vector<66x64xf32>
    %62 = arith.maximumf %60, %61 : vector<66x64xf32>
    %c7_57 = arith.constant 7 : index
    %c0_58 = arith.constant 0 : index
    %63 = vector.load %arg13[%c7_57, %c0_58] : memref<74x64xf32, #tpu.memory_space<vmem>>, vector<66x64xf32>
    %c8_59 = arith.constant 8 : index
    %c0_60 = arith.constant 0 : index
    %64 = vector.load %arg13[%c8_59, %c0_60] : memref<74x64xf32, #tpu.memory_space<vmem>>, vector<66x64xf32>
    %65 = arith.maximumf %63, %64 : vector<66x64xf32>
    %66 = arith.maximumf %62, %65 : vector<66x64xf32>
    %cst_61 = arith.constant 0.000000e+00 : f32
    %67 = vector.broadcast %cst_61 : f32 to vector<66x64xf32>
    %68 = arith.maximumf %66, %67 : vector<66x64xf32>
    %c0_62 = arith.constant 0 : index
    %c0_63 = arith.constant 0 : index
    %69 = vector.load %arg14[%c0_62, %c0_63] : memref<66x64xf32, #tpu.memory_space<vmem>>, vector<66x64xf32>
    tpu.vector_store %arg14[%c0_62, %c0_63], %68 {strides = array<i32>} : memref<66x64xf32, #tpu.memory_space<vmem>>, vector<66x64xf32>,
    %cst_64 = arith.constant 0.000000e+00 : f32
    %70 = vector.broadcast %cst_64 : f32 to vector<2x512xf32>
    %c0_65 = arith.constant 0 : index
    %c0_66 = arith.constant 0 : index
    %71 = vector.load %arg15[%c0_65, %c0_66] : memref<2x512xf32, #tpu.memory_space<vmem>>, vector<2x512xf32>
    tpu.vector_store %arg15[%c0_65, %c0_66], %70 {strides = array<i32>} : memref<2x512xf32, #tpu.memory_space<vmem>>, vector<2x512xf32>,
    %c0_67 = arith.constant 0 : index
    %c0_68 = arith.constant 0 : index
    %72 = vector.load %arg14[%c0_67, %c0_68] : memref<66x64xf32, #tpu.memory_space<vmem>>, vector<1x64xf32>
    %c0_69 = arith.constant 0 : index
    %c0_70 = arith.constant 0 : index
    %73 = vector.load %arg15[%c0_69, %c0_70] : memref<2x512xf32, #tpu.memory_space<vmem>>, vector<1x64xf32>
    tpu.vector_store %arg15[%c0_69, %c0_70], %72 {strides = array<i32>} : memref<2x512xf32, #tpu.memory_space<vmem>>, vector<1x64xf32>,
    %c2_71 = arith.constant 2 : index
    %c0_72 = arith.constant 0 : index
    %74 = vector.load %arg14[%c2_71, %c0_72] : memref<66x64xf32, #tpu.memory_space<vmem>>, vector<1x64xf32>
    %c0_73 = arith.constant 0 : index
    %c128_74 = arith.constant 128 : index
    %75 = vector.load %arg15[%c0_73, %c128_74] : memref<2x512xf32, #tpu.memory_space<vmem>>, vector<1x64xf32>
    tpu.vector_store %arg15[%c0_73, %c128_74], %74 {strides = array<i32>} : memref<2x512xf32, #tpu.memory_space<vmem>>, vector<1x64xf32>,
    %c14_75 = arith.constant 14 : index
    %c0_76 = arith.constant 0 : index
    %76 = vector.load %arg14[%c14_75, %c0_76] : memref<66x64xf32, #tpu.memory_space<vmem>>, vector<1x64xf32>
    %c0_77 = arith.constant 0 : index
    %c256_78 = arith.constant 256 : index
    %77 = vector.load %arg15[%c0_77, %c256_78] : memref<2x512xf32, #tpu.memory_space<vmem>>, vector<1x64xf32>
    tpu.vector_store %arg15[%c0_77, %c256_78], %76 {strides = array<i32>} : memref<2x512xf32, #tpu.memory_space<vmem>>, vector<1x64xf32>,
    %c16_79 = arith.constant 16 : index
    %c0_80 = arith.constant 0 : index
    %78 = vector.load %arg14[%c16_79, %c0_80] : memref<66x64xf32, #tpu.memory_space<vmem>>, vector<1x64xf32>
    %c0_81 = arith.constant 0 : index
    %c384 = arith.constant 384 : index
    %79 = vector.load %arg15[%c0_81, %c384] : memref<2x512xf32, #tpu.memory_space<vmem>>, vector<1x64xf32>
    tpu.vector_store %arg15[%c0_81, %c384], %78 {strides = array<i32>} : memref<2x512xf32, #tpu.memory_space<vmem>>, vector<1x64xf32>,
    %c49 = arith.constant 49 : index
    %c0_82 = arith.constant 0 : index
    %80 = vector.load %arg14[%c49, %c0_82] : memref<66x64xf32, #tpu.memory_space<vmem>>, vector<1x64xf32>
    %c1_83 = arith.constant 1 : index
    %c0_84 = arith.constant 0 : index
    %81 = vector.load %arg15[%c1_83, %c0_84] : memref<2x512xf32, #tpu.memory_space<vmem>>, vector<1x64xf32>
    tpu.vector_store %arg15[%c1_83, %c0_84], %80 {strides = array<i32>} : memref<2x512xf32, #tpu.memory_space<vmem>>, vector<1x64xf32>,
    %c51 = arith.constant 51 : index
    %c0_85 = arith.constant 0 : index
    %82 = vector.load %arg14[%c51, %c0_85] : memref<66x64xf32, #tpu.memory_space<vmem>>, vector<1x64xf32>
    %c1_86 = arith.constant 1 : index
    %c128_87 = arith.constant 128 : index
    %83 = vector.load %arg15[%c1_86, %c128_87] : memref<2x512xf32, #tpu.memory_space<vmem>>, vector<1x64xf32>
    tpu.vector_store %arg15[%c1_86, %c128_87], %82 {strides = array<i32>} : memref<2x512xf32, #tpu.memory_space<vmem>>, vector<1x64xf32>,
    %c63 = arith.constant 63 : index
    %c0_88 = arith.constant 0 : index
    %84 = vector.load %arg14[%c63, %c0_88] : memref<66x64xf32, #tpu.memory_space<vmem>>, vector<1x64xf32>
    %c1_89 = arith.constant 1 : index
    %c256_90 = arith.constant 256 : index
    %85 = vector.load %arg15[%c1_89, %c256_90] : memref<2x512xf32, #tpu.memory_space<vmem>>, vector<1x64xf32>
    tpu.vector_store %arg15[%c1_89, %c256_90], %84 {strides = array<i32>} : memref<2x512xf32, #tpu.memory_space<vmem>>, vector<1x64xf32>,
    %c65 = arith.constant 65 : index
    %c0_91 = arith.constant 0 : index
    %86 = vector.load %arg14[%c65, %c0_91] : memref<66x64xf32, #tpu.memory_space<vmem>>, vector<1x64xf32>
    %c1_92 = arith.constant 1 : index
    %c384_93 = arith.constant 384 : index
    %87 = vector.load %arg15[%c1_92, %c384_93] : memref<2x512xf32, #tpu.memory_space<vmem>>, vector<1x64xf32>
    tpu.vector_store %arg15[%c1_92, %c384_93], %86 {strides = array<i32>} : memref<2x512xf32, #tpu.memory_space<vmem>>, vector<1x64xf32>,
    %c0_94 = arith.constant 0 : index
    %c0_95 = arith.constant 0 : index
    %88 = vector.load %arg15[%c0_94, %c0_95] : memref<2x512xf32, #tpu.memory_space<vmem>>, vector<2x512xf32>
    %c0_96 = arith.constant 0 : index
    %c0_97 = arith.constant 0 : index
    %89 = vector.load %arg5[%c0_96, %c0_97] : memref<512x128xf32, #tpu.memory_space<vmem>>, vector<512x128xf32>
    %cst_98 = arith.constant dense<0.000000e+00> : vector<2x128xf32>
    %90 = tpu.matmul %88, %89, %cst_98 {dimension_numbers = #tpu.dot_dimension_numbers<[1], [0], [0], [1], [0, 0, 1, 1], [], []>} : vector<2x512xf32>, vector<512x128xf32>, vector<2x128xf32> -> vector<2x128xf32>
    %c0_99 = arith.constant 0 : index
    %c0_100 = arith.constant 0 : index
    %91 = vector.load %arg6[%c0_99, %c0_100] : memref<1x128xf32, #tpu.memory_space<vmem>>, vector<1x128xf32>
    %92 = vector.broadcast %91 : vector<1x128xf32> to vector<2x128xf32>
    %93 = arith.addf %90, %92 : vector<2x128xf32>
    %cst_101 = arith.constant 0.000000e+00 : f32
    %94 = vector.broadcast %cst_101 : f32 to vector<2x128xf32>
    %95 = arith.maximumf %93, %94 : vector<2x128xf32>
    %c0_102 = arith.constant 0 : index
    %c0_103 = arith.constant 0 : index
    %96 = vector.load %arg7[%c0_102, %c0_103] : memref<128x128xf32, #tpu.memory_space<vmem>>, vector<128x128xf32>
    %cst_104 = arith.constant dense<0.000000e+00> : vector<2x128xf32>
    %97 = tpu.matmul %95, %96, %cst_104 {dimension_numbers = #tpu.dot_dimension_numbers<[1], [0], [0], [1], [0, 0, 1, 1], [], []>} : vector<2x128xf32>, vector<128x128xf32>, vector<2x128xf32> -> vector<2x128xf32>
    %c0_105 = arith.constant 0 : index
    %c0_106 = arith.constant 0 : index
    %98 = vector.load %arg8[%c0_105, %c0_106] : memref<1x128xf32, #tpu.memory_space<vmem>>, vector<1x128xf32>
    %99 = vector.broadcast %98 : vector<1x128xf32> to vector<2x128xf32>
    %100 = arith.addf %97, %99 : vector<2x128xf32>
    %cst_107 = arith.constant 0.000000e+00 : f32
    %101 = vector.broadcast %cst_107 : f32 to vector<2x128xf32>
    %102 = arith.maximumf %100, %101 : vector<2x128xf32>
    %c0_108 = arith.constant 0 : index
    %c0_109 = arith.constant 0 : index
    %103 = vector.load %arg9[%c0_108, %c0_109] : memref<128x128xf32, #tpu.memory_space<vmem>>, vector<128x128xf32>
    %cst_110 = arith.constant dense<0.000000e+00> : vector<2x128xf32>
    %104 = tpu.matmul %102, %103, %cst_110 {dimension_numbers = #tpu.dot_dimension_numbers<[1], [0], [0], [1], [0, 0, 1, 1], [], []>} : vector<2x128xf32>, vector<128x128xf32>, vector<2x128xf32> -> vector<2x128xf32>
    %c0_111 = arith.constant 0 : index
    %c0_112 = arith.constant 0 : index
    %105 = vector.load %arg10[%c0_111, %c0_112] : memref<1x128xf32, #tpu.memory_space<vmem>>, vector<1x128xf32>
    %106 = vector.broadcast %105 : vector<1x128xf32> to vector<2x128xf32>
    %107 = arith.addf %104, %106 : vector<2x128xf32>
    %cst_113 = arith.constant 0.000000e+00 : f32
    %108 = vector.broadcast %cst_113 : f32 to vector<2x128xf32>
    %109 = arith.maximumf %107, %108 : vector<2x128xf32>
    %110 = vector.extract_strided_slice %109 {offsets = [0, 0], sizes = [2, 100], strides = [1, 1]} : vector<2x128xf32> to vector<2x100xf32>
    %cst_114 = arith.constant dense<0xFF800000> : vector<2xf32>
    %111 = vector.multi_reduction <maximumf>, %110, %cst_114 [1] : vector<2x100xf32> to vector<2xf32>
    %112 = vector.shape_cast %111 : vector<2xf32> to vector<2x1xf32>
    %113 = vector.broadcast %112 : vector<2x1xf32> to vector<2x100xf32>
    %114 = arith.subf %110, %113 : vector<2x100xf32>
    %115 = math.exp %114 : vector<2x100xf32>
    %cst_115 = arith.constant dense<0.000000e+00> : vector<2xf32>
    %116 = vector.multi_reduction <add>, %115, %cst_115 [1] : vector<2x100xf32> to vector<2xf32>
    %117 = vector.shape_cast %116 : vector<2xf32> to vector<2x1xf32>
    %118 = tpu.reciprocal %117 : vector<2x1xf32> -> vector<2x1xf32>
    %119 = vector.broadcast %118 : vector<2x1xf32> to vector<2x100xf32>
    %120 = arith.mulf %115, %119 : vector<2x100xf32>
    %c0_116 = arith.constant 0 : index
    %c0_117 = arith.constant 0 : index
    %121 = vector.load %arg11[%c0_116, %c0_117] : memref<2x100xf32, #tpu.memory_space<vmem>>, vector<2x100xf32>
    tpu.vector_store %arg11[%c0_116, %c0_117], %120 {strides = array<i32>} : memref<2x100xf32, #tpu.memory_space<vmem>>, vector<2x100xf32>,
    return
  }
}

</mosaic_0001>

<bundles_post_ra>
// kernel: clay_classifier_forward.1
= control target key start
LH: loop header
LB: loop body
LE: loop exit
PB: predicated region body
PF: predicated region fallthrough
CT: control target
= control target key end

     0   :  { %vm97_vm0 = vcmask 1043456   ;;  %vm57_vm1 = vcmask 293888   ;;  %s3049_s0 = inlined_call_operand.vmem [shape: f32[392,36], index: 0, kind: input, shape index: {}]   ;;  %s3050_s1 = inlined_call_operand.vmem [shape: f32[36,32], index: 1, kind: input, shape index: {}]   ;;  %s3051_s2 = inlined_call_operand.vmem [shape: f32[1,32], index: 2, kind: input, shape index: {}]   ;;  %s3052_s3 = inlined_call_operand.vmem [shape: f32[288,64], index: 3, kind: input, shape index: {}]   ;;  %s3053_s4 = inlined_call_operand.vmem [shape: f32[1,64], index: 4, kind: input, shape index: {}]   ;;  %s3054_s5 = inlined_call_operand.vmem [shape: f32[512,128], index: 5, kind: input, shape index: {}]   ;;  %s3055_s6 = inlined_call_operand.vmem [shape: f32[1,128], index: 6, kind: input, shape index: {}]   ;;  %s3056_s7 = inlined_call_operand.vmem [shape: f32[128,128], index: 7, kind: input, shape index: {}]   ;;  %s3057_s8 = inlined_call_operand.vmem [shape: f32[1,128], index: 8, kind: input, shape index: {}]   ;;  %s3058_s9 = inlined_call_operand.vmem [shape: f32[128,128], index: 9, kind: input, shape index: {}]   ;;  %s3059_s10 = inlined_call_operand.vmem [shape: f32[1,128], index: 10, kind: input, shape index: {}]   ;;  %s3060_s11 = inlined_call_operand.hbm [shape: f32[2,100], index: 11, kind: output, shape index: {}]  }
   0x1   :  { %v56_v0 = vld [vmem:[%s3050_s1 + $0x20] sm:$0xf]  ;;  %v55_v1 = vld [vmem:[%s3050_s1 + $0x18] sm:$0xff]  ;;  %v54_v2 = vld [vmem:[%s3050_s1 + $0x10] sm:$0xff] }
   0x2   :  { %2002 = vmatpush.msk.msra.mxu1 %vm97_vm0, %v56_v0  ;;  %2003 = vmatpush.msk.msra.mxu2 %vm97_vm0, %v56_v0  ;;  %v53_v3 = vld [vmem:[%s3050_s1 + $0x8] sm:$0xff]  ;;  %v52_v4 = vld [vmem:[%s3050_s1] sm:$0xff]  ;;  %v49_v5 = vld [vmem:[%s3049_s0 + $0x50] sm:$0xff] }
   0x3   :  { %1898 = vmatpush.msk.msra.mxu3 %vm97_vm0, %v56_v0  ;;  %1856 = vmatpush.msk.msra.mxu0 %vm97_vm0, %v56_v0  ;;  %v51_v6 = vld [vmem:[%s3049_s0 + $0x60] sm:$0x3] }
   0x4   :  { %2004 = vmatpush.msra.mxu1 %v55_v1  ;;  %2005 = vmatpush.msra.mxu2 %v55_v1 }
   0x5   :  { %450 = vmatpush.msra.mxu3 %v55_v1  ;;  %113 = vmatpush.msra.mxu0 %v55_v1 }
   0x6   :  { %2006 = vmatpush.msra.mxu1 %v54_v2  ;;  %2007 = vmatpush.msra.mxu2 %v54_v2 }
   0x7   :  { %451 = vmatpush.msra.mxu3 %v54_v2  ;;  %114 = vmatpush.msra.mxu0 %v54_v2 }
   0x8   :  { %2008 = vmatpush.msra.mxu1 %v53_v3  ;;  %2009 = vmatpush.msra.mxu2 %v53_v3 }
   0x9   :  { %452 = vmatpush.msra.mxu3 %v53_v3  ;;  %115 = vmatpush.msra.mxu0 %v53_v3 }
   0xa   :  { %16 = vsyncpa [#allocation7], 0  ;;  %2010 = vmatpush.msra.mxu1 %v52_v4  ;;  %2011 = vmatpush.msra.mxu2 %v52_v4  ;;  %v386_v7 = vld [vmem:[%s3049_s0 + $0x126] sm:$0xff]  ;;  %v50_v9 = vld [vmem:[%s3049_s0 + $0x58] sm:$0xff]  ;;  %vm550_vm2 = vcmask 261120   ;;  %vm1468_vm3 = vcmask 523264  }
   0xb   :  { %1867 = vmatmul.msk.f32.vlgmr.msra.gmra.mxu1 %vm57_vm1, %v49_v5  ;;  %1869 = vmatmul.msk.f32.vlgmr.msra.gmra.mxu2 %vm57_vm1, %v51_v6  ;;  %v39_v8 = vld [vmem:[%s3049_s0] sm:$0xff]  ;;  %v387_v11 = vld [vmem:[%s3049_s0 + $0x12e] sm:$0xff]  ;;  %v388_v15 = vld [vmem:[%s3049_s0 + $0x136] sm:$0xff]  ;;  %vm1556_vm4 = vcmask 516096   ;;  %vm1478_vm5 = vcmask 517120   ;;  %vm1814_vm6 = vcmask 812032  }
   0xc   :  { %1884 = vmatpush.msk.msrb.mxu2 %vm97_vm0, %v56_v0  ;;  %1870 = vmatpush.msk.msrb.mxu1 %vm97_vm0, %v56_v0  ;;  %v278_v10 = vld [vmem:[%s3049_s0 + $0xc4] sm:$0xff]  ;;  %v279_v14 = vld [vmem:[%s3049_s0 + $0xcc] sm:$0xff]  ;;  %v280_v18 = vld [vmem:[%s3049_s0 + $0xd4] sm:$0xff]  ;;  %s1847_s21 = sshll.u32 %s3060_s11, 4  ;;  %s1848_s21 = int_to_ptr.hbm [resolvable:$true] %s1847_s21 }
   0xd   :  { %453 = vmatpush.msra.mxu3 %v52_v4  ;;  %116 = vmatpush.msra.mxu0 %v52_v4  ;;  %v40_v12 = vld [vmem:[%s3049_s0 + $0x8] sm:$0xff]  ;;  %v41_v16 = vld [vmem:[%s3049_s0 + $0x10] sm:$0xff]  ;;  %v389_v19 = vld [vmem:[%s3049_s0 + $0x13e] sm:$0xff] }
   0xe   :  { %342 = vmatpush.msrb.mxu2 %v55_v1  ;;  %221 = vmatpush.msrb.mxu1 %v55_v1  ;;  %v157_v13 = vld [vmem:[%s3049_s0 + $0x62] sm:$0xff]  ;;  %v158_v17 = vld [vmem:[%s3049_s0 + $0x6a] sm:$0xff]  ;;  %v42_v20 = vld [vmem:[%s3049_s0 + $0x18] sm:$0xff] }
   0xf   :  { %1899 = vmatmul.msk.f32.vlgmr.msra.gmra.mxu3 %vm57_vm1, %v386_v7  ;;  %1857 = vmatmul.msk.f32.vlgmr.msra.gmra.mxu0 %vm57_vm1, %v39_v8  ;;  %v159_v21 = vld [vmem:[%s3049_s0 + $0x72] sm:$0xff]  ;;  %v281_v22 = vld [vmem:[%s3049_s0 + $0xdc] sm:$0xff]  ;;  %v390_v23 = vld [vmem:[%s3049_s0 + $0x146] sm:$0xff] }
  0x10   :  { %343 = vmatpush.msrb.mxu2 %v54_v2  ;;  %222 = vmatpush.msrb.mxu1 %v54_v2  ;;  %v43_v24 = vld [vmem:[%s3049_s0 + $0x20] sm:$0xff]  ;;  %v391_v27 = vld [vmem:[%s3049_s0 + $0x14e] sm:$0xff]  ;;  %v578_v28 = vld [vmem:[%s3052_s3 + $0x18] sm:$0xff] }
  0x11   :  { %v160_v25 = vld [vmem:[%s3049_s0 + $0x7a] sm:$0xff]  ;;  %v282_v26 = vld [vmem:[%s3049_s0 + $0xe4] sm:$0xff]  ;;  %625 = vmatpush.msrb.mxu0 %v578_v28  ;;  %v283_v31 = vld [vmem:[%s3049_s0 + $0xec] sm:$0xff] }
  0x12   :  { %344 = vmatpush.msrb.mxu2 %v53_v3  ;;  %223 = vmatpush.msrb.mxu1 %v53_v3  ;;  %v44_v29 = vld [vmem:[%s3049_s0 + $0x28] sm:$0xff]  ;;  %v392_v32 = vld [vmem:[%s3049_s0 + $0x156] sm:$0xff]  ;;  %v393_v36 = vld [vmem:[%s3049_s0 + $0x15e] sm:$0xff] }
  0x13   :  { %1868 = vmatmul.msk.f32.gmra.mxu1 %vm57_vm1, %v50_v9  ;;  %v161_v30 = vld [vmem:[%s3049_s0 + $0x82] sm:$0xff]  ;;  %v45_v33 = vld [vmem:[%s3049_s0 + $0x30] sm:$0xff]  ;;  %v46_v37 = vld [vmem:[%s3049_s0 + $0x38] sm:$0xff] }
  0x14   :  { %345 = vmatpush.msrb.mxu2 %v52_v4  ;;  %224 = vmatpush.msrb.mxu1 %v52_v4  ;;  %v162_v34 = vld [vmem:[%s3049_s0 + $0x8a] sm:$0xff]  ;;  %v284_v35 = vld [vmem:[%s3049_s0 + $0xf4] sm:$0xff]  ;;  %v285_v39 = vld [vmem:[%s3049_s0 + $0xfc] sm:$0xff] }
  0x15   :  { %1885 = vmatmul.msk.f32.vlgmr.msrb.gmra.mxu2 %vm57_vm1, %v278_v10  ;;  %v163_v38 = vld [vmem:[%s3049_s0 + $0x92] sm:$0xff]  ;;  %v394_v40 = vld [vmem:[%s3049_s0 + $0x166] sm:$0xff]  ;;  %v164_v43 = vld [vmem:[%s3049_s0 + $0x9a] sm:$0xff] }
  0x16   :  { %v577_v41 = vld [vmem:[%s3052_s3 + $0x10] sm:$0xff]  ;;  %v47_v42 = vld [vmem:[%s3049_s0 + $0x40] sm:$0xff]  ;;  %v48_v46 = vld [vmem:[%s3049_s0 + $0x48] sm:$0xff] }
  0x17   :  { %1900 = vmatmul.msk.f32.gmra.mxu3 %vm57_vm1, %v387_v11  ;;  %1858 = vmatmul.msk.f32.gmra.mxu0 %vm57_vm1, %v40_v12  ;;  %v286_v44 = vld [vmem:[%s3049_s0 + $0x104] sm:$0xff]  ;;  %v395_v45 = vld [vmem:[%s3049_s0 + $0x16e] sm:$0xff]  ;;  %v396_v49 = vld [vmem:[%s3049_s0 + $0x176] sm:$0xff] }
  0x18   :  { %626 = vmatpush.msrb.mxu0 %v577_v41  ;;  %v165_v47 = vld [vmem:[%s3049_s0 + $0xa2] sm:$0xff]  ;;  %v287_v48 = vld [vmem:[%s3049_s0 + $0x10c] sm:$0xff]  ;;  %v774_v51 = vld [vmem:[%s3052_s3 + $0x58] sm:$0xff] }
  0x19   :  { %v576_v50 = vld [vmem:[%s3052_s3 + $0x8] sm:$0xff]  ;;  %817 = vmatpush.msra.mxu2 %v774_v51  ;;  %v288_v53 = vld [vmem:[%s3049_s0 + $0x114] sm:$0xff]  ;;  %v397_v54 = vld [vmem:[%s3049_s0 + $0x17e] sm:$0xff] }
  0x1a   :  { %627 = vmatpush.msrb.mxu0 %v576_v50  ;;  %v166_v52 = vld [vmem:[%s3049_s0 + $0xaa] sm:$0xff]  ;;  %v167_v55 = vld [vmem:[%s3049_s0 + $0xb2] sm:$0xff]  ;;  %v289_v58 = vld [vmem:[%s3049_s0 + $0x11c] sm:$0xff] }
  0x1b   :  { %1871 = vmatmul.msk.f32.vlgmr.msrb.gmra.mxu1 %vm57_vm1, %v157_v13  ;;  %v875_v56 = vld [vmem:[%s3052_s3 + $0x78] sm:$0xff]  ;;  %v398_v59 = vld [vmem:[%s3049_s0 + $0x186] sm:$0x3]  ;;  %v290_v62 = vld [vmem:[%s3049_s0 + $0x124] sm:$0x3] }
  0x1c   :  { %v673_v57 = vld [vmem:[%s3052_s3 + $0x38] sm:$0xff]  ;;  %918 = vmatpush.msrb.mxu3 %v875_v56  ;;  %v575_v61 = vld [vmem:[%s3052_s3] sm:$0xff]  ;;  %v773_v1 = vld [vmem:[%s3052_s3 + $0x50] sm:$0xff] }
  0x1d   :  { %1886 = vmatmul.msk.f32.gmra.mxu2 %vm57_vm1, %v279_v14  ;;  %716 = vmatpush.msra.mxu1 %v673_v57  ;;  %v168_v60 = vld [vmem:[%s3049_s0 + $0xba] sm:$0xff]  ;;  %v169_v63 = vld [vmem:[%s3049_s0 + $0xc2] sm:$0x3]  ;;  %v874_v2 = vld [vmem:[%s3052_s3 + $0x70] sm:$0xff] }
  0x1e   :  { %628 = vmatpush.msrb.mxu0 %v575_v61  ;;  %v672_v3 = vld [vmem:[%s3052_s3 + $0x30] sm:$0xff]  ;;  %818 = vmatpush.msra.mxu2 %v773_v1  ;;  %v671_v5 = vld [vmem:[%s3052_s3 + $0x28] sm:$0xff]  ;;  %v670_v9 = vld [vmem:[%s3052_s3 + $0x20] sm:$0xff] }
  0x1f   :  { %1901 = vmatmul.msk.f32.gmra.mxu3 %vm57_vm1, %v388_v15  ;;  %1859 = vmatmul.msk.f32.gmra.mxu0 %vm57_vm1, %v41_v16  ;;  %v772_v6 = vld [vmem:[%s3052_s3 + $0x48] sm:$0xff]  ;;  %v771_v10 = vld [vmem:[%s3052_s3 + $0x40] sm:$0xff]  ;;  %v976_v14 = vld [vmem:[%s3052_s3 + $0x98] sm:$0xff] }
  0x20   :  { %919 = vmatpush.msrb.mxu3 %v874_v2  ;;  %717 = vmatpush.msra.mxu1 %v672_v3  ;;  %v873_v7 = vld [vmem:[%s3052_s3 + $0x68] sm:$0xff]  ;;  %v872_v11 = vld [vmem:[%s3052_s3 + $0x60] sm:$0xff] }
  0x21   :  { %819 = vmatpush.msra.mxu2 %v772_v6  ;;  %1019 = vmatpush.msra.mxu0 %v976_v14 }
  0x22   :  { %718 = vmatpush.msra.mxu1 %v671_v5  ;;  %920 = vmatpush.msrb.mxu3 %v873_v7  ;;  %v974_v5 = vld [vmem:[%s3052_s3 + $0x88] sm:$0xff] }
  0x23   :  { %1872 = vmatmul.msk.f32.gmra.mxu1 %vm57_vm1, %v158_v17  ;;  %820 = vmatpush.msra.mxu2 %v771_v10 }
  0x24   :  { %719 = vmatpush.msra.mxu1 %v670_v9  ;;  %921 = vmatpush.msrb.mxu3 %v872_v11 }
  0x25   :  { %1887 = vmatmul.msk.f32.gmra.mxu2 %vm57_vm1, %v280_v18 }
  0x27   :  { %1902 = vmatmul.msk.f32.gmra.mxu3 %vm57_vm1, %v389_v19  ;;  %1860 = vmatmul.msk.f32.gmra.mxu0 %vm57_vm1, %v42_v20  ;;  %v2398_v20 = vld [vmem:[%s3051_s2] ss:$0 sm:$0xff] }
  0x2b   :  { %1873 = vmatmul.msk.f32.gmra.mxu1 %vm57_vm1, %v159_v21 }
  0x2d   :  { %1888 = vmatmul.msk.f32.gmra.mxu2 %vm57_vm1, %v281_v22 }
  0x2f   :  { %1903 = vmatmul.msk.f32.gmra.mxu3 %vm57_vm1, %v390_v23  ;;  %1861 = vmatmul.msk.f32.gmra.mxu0 %vm57_vm1, %v43_v24 }
  0x33   :  { %1874 = vmatmul.msk.f32.gmra.mxu1 %vm57_vm1, %v160_v25 }
  0x35   :  { %1889 = vmatmul.msk.f32.gmra.mxu2 %vm57_vm1, %v282_v26 }
  0x37   :  { %1904 = vmatmul.msk.f32.gmra.mxu3 %vm57_vm1, %v391_v27  ;;  %1862 = vmatmul.msk.f32.gmra.mxu0 %vm57_vm1, %v44_v29 }
  0x3b   :  { %1875 = vmatmul.msk.f32.gmra.mxu1 %vm57_vm1, %v161_v30 }
  0x3d   :  { %1890 = vmatmul.msk.f32.gmra.mxu2 %vm57_vm1, %v283_v31  ;;  %v975_v31 = vld [vmem:[%s3052_s3 + $0x90] sm:$0xff] }
  0x3e   :  { %1020 = vmatpush.msra.mxu0 %v975_v31 }
  0x3f   :  { %1905 = vmatmul.msk.f32.gmra.mxu3 %vm57_vm1, %v392_v32  ;;  %1863 = vmatmul.msk.f32.gmra.mxu0 %vm57_vm1, %v45_v33 }
  0x40   :  { %1021 = vmatpush.msra.mxu0 %v974_v5  ;;  %v1076_v5 = vld [vmem:[%s3052_s3 + $0xb0] sm:$0xff] }
  0x43   :  { %1876 = vmatmul.msk.f32.gmra.mxu1 %vm57_vm1, %v162_v34 }
  0x45   :  { %1891 = vmatmul.msk.f32.gmra.mxu2 %vm57_vm1, %v284_v35 }
  0x47   :  { %1906 = vmatmul.msk.f32.gmra.mxu3 %vm57_vm1, %v393_v36  ;;  %1864 = vmatmul.msk.f32.gmra.mxu0 %vm57_vm1, %v46_v37 }
  0x4b   :  { %1877 = vmatmul.msk.f32.gmra.mxu1 %vm57_vm1, %v163_v38 }
  0x4d   :  { %1892 = vmatmul.msk.f32.gmra.mxu2 %vm57_vm1, %v285_v39 }
  0x4f   :  { %1907 = vmatmul.msk.f32.gmra.mxu3 %vm57_vm1, %v394_v40  ;;  %1865 = vmatmul.msk.f32.gmra.mxu0 %vm57_vm1, %v47_v42 }
  0x53   :  { %1878 = vmatmul.msk.f32.gmra.mxu1 %vm57_vm1, %v164_v43 }
  0x55   :  { %1893 = vmatmul.msk.f32.gmra.mxu2 %vm57_vm1, %v286_v44 }
  0x57   :  { %1908 = vmatmul.msk.f32.gmra.mxu3 %vm57_vm1, %v395_v45  ;;  %1866 = vmatmul.msk.f32.gmra.mxu0 %vm57_vm1, %v48_v46 }
  0x5b   :  { %1879 = vmatmul.msk.f32.gmra.mxu1 %vm57_vm1, %v165_v47 }
  0x5d   :  { %1894 = vmatmul.msk.f32.gmra.mxu2 %vm57_vm1, %v287_v48 }
  0x5f   :  { %1909 = vmatmul.msk.f32.gmra.mxu3 %vm57_vm1, %v396_v49 }
  0x63   :  { %1880 = vmatmul.msk.f32.gmra.mxu1 %vm57_vm1, %v166_v52 }
  0x65   :  { %1895 = vmatmul.msk.f32.gmra.mxu2 %vm57_vm1, %v288_v53 }
  0x67   :  { %1910 = vmatmul.msk.f32.gmra.mxu3 %vm57_vm1, %v397_v54 }
  0x6b   :  { %1881 = vmatmul.msk.f32.gmra.mxu1 %vm57_vm1, %v167_v55 }
  0x6d   :  { %1896 = vmatmul.msk.f32.gmra.mxu2 %vm57_vm1, %v289_v58 }
  0x6f   :  { %1911 = vmatmul.msk.f32.gmra.mxu3 %vm57_vm1, %v398_v59 }
  0x73   :  { %1882 = vmatmul.msk.f32.gmra.mxu1 %vm57_vm1, %v168_v60 }
  0x75   :  { %1897 = vmatmul.msk.f32.gmra.mxu2 %vm57_vm1, %v290_v62 }
  0x7b   :  { %1883 = vmatmul.msk.f32.gmra.mxu1 %vm57_vm1, %v169_v63 }
  0x88   :  { %v2361_v0 = vpop.f32.mrf.mxu1 }
  0x8c   :  { %v118_v4 = vpop.f32.mrf.mxu0 }
  0x8e   :  { %v154_v8 = vpop.f32.mrf.mxu2 }
  0x90   :  { %v2390_v12 = vpop.f32.mrf.mxu1 }
  0x92   :  { %v455_v13 = vpop.f32.mrf.mxu3 }
  0x94   :  { %v121_v15 = vpop.f32.mrf.mxu0 }
  0x98   :  { %v347_v16 = vpop.f32.mrf.mxu2  ;;  %v226_v17 = vpop.f32.mrf.mxu1 }
  0x99   :  { %v494_v18 = vmax.f32 %v347_v16, %v455_v13  ;;  %v265_v19 = vmax.f32 %v118_v4, %v226_v17 }
  0x9a   :  { %v458_v21 = vpop.f32.mrf.mxu3 }
  0x9b   :  { %v507_v22 = vmax.f32 %v265_v19, %v494_v18 }
  0x9c   :  { %v124_v24 = vpop.f32.mrf.mxu0 }
  0x9d   :  { %v524_v23 = vadd.f32 %v2398_v20, %v507_v22 }
  0x9f   :  { %v537_v25 = vmax.f32 %v524_v23, 0.0 }
  0xa0   :  { %v350_v26 = vpop.f32.mrf.mxu2  ;;  %v229_v27 = vpop.f32.mrf.mxu1 }
  0xa1   :  { %v495_v28 = vmax.f32 %v350_v26, %v458_v21  ;;  %551 = vst.msk [vmem:[#allocation2] sm:$0xff] %vm550_vm2, %v537_v25  ;;  %v266_v29 = vmax.f32 %v121_v15, %v229_v27 }
  0xa2   :  { %v461_v30 = vpop.f32.mrf.mxu3 }
  0xa3   :  { %v508_v32 = vmax.f32 %v266_v29, %v495_v28 }
  0xa4   :  { %v127_v34 = vpop.f32.mrf.mxu0 }
  0xa5   :  { %v525_v33 = vadd.f32 %v2398_v20, %v508_v32 }
  0xa7   :  { %v538_v35 = vmax.f32 %v525_v33, 0.0  ;;  %v973_v33 = vld [vmem:[%s3052_s3 + $0x80] sm:$0xff] }
  0xa8   :  { %v353_v36 = vpop.f32.mrf.mxu2  ;;  %v232_v37 = vpop.f32.mrf.mxu1  ;;  %v565_v39 = vld [vmem:[#allocation2] sm:$0xff]  ;;  %1022 = vmatpush.msra.mxu0 %v973_v33  ;;  %v1175_v33 = vld [vmem:[%s3052_s3 + $0xc0] sm:$0xff] }
  0xa9   :  { %v496_v38 = vmax.f32 %v353_v36, %v461_v30  ;;  %552 = vst.msk [vmem:[#allocation2 + $0x8] sm:$0xff] %vm550_vm2, %v538_v35  ;;  %v267_v40 = vmax.f32 %v124_v24, %v232_v37  ;;  %1912 = vmatmul.msk.f32.vlgmr.msrb.gmra.mxu0 %vm550_vm2, %v565_v39 }
  0xaa   :  { %v464_v41 = vpop.f32.mrf.mxu3 }
  0xab   :  { %v509_v42 = vmax.f32 %v267_v40, %v496_v38 }
  0xac   :  { %v130_v44 = vpop.f32.mrf.mxu0 }
  0xad   :  { %v526_v43 = vadd.f32 %v2398_v20, %v509_v42 }
  0xaf   :  { %v539_v45 = vmax.f32 %v526_v43, 0.0 }
  0xb0   :  { %v356_v46 = vpop.f32.mrf.mxu2  ;;  %v235_v47 = vpop.f32.mrf.mxu1  ;;  %v2409_v49 = vld [vmem:[#allocation2 + $0x8] sm:$0xff] }
  0xb1   :  { %v497_v48 = vmax.f32 %v356_v46, %v464_v41  ;;  %v660_v50 = vld [vmem:[#allocation2 + $0x1] sm:$0xff]  ;;  %553 = vst.msk [vmem:[#allocation2 + $0x10] sm:$0xff] %vm550_vm2, %v539_v45  ;;  %v268_v52 = vmax.f32 %v127_v34, %v235_v47  ;;  %1913 = vmatmul.msk.f32.gmra.mxu0 %vm550_vm2, %v2409_v49  ;;  %v1178_v47 = vld [vmem:[%s3052_s3 + $0xd8] sm:$0xff] }
  0xb2   :  { %v761_v51 = vld [vmem:[#allocation2 + $0x2] sm:$0xff]  ;;  %1922 = vmatmul.msk.f32.vlgmr.msra.gmra.mxu1 %vm550_vm2, %v660_v50  ;;  %v467_v54 = vpop.f32.mrf.mxu3  ;;  %1221 = vmatpush.msrb.mxu2 %v1178_v47 }
  0xb3   :  { %v862_v53 = vld [vmem:[#allocation2 + $0x7] sm:$0xff]  ;;  %1932 = vmatmul.msk.f32.vlgmr.msra.gmra.mxu2 %vm550_vm2, %v761_v51  ;;  %v510_v55 = vmax.f32 %v268_v52, %v497_v48 }
  0xb4   :  { %1942 = vmatmul.msk.f32.vlgmr.msrb.gmra.mxu3 %vm550_vm2, %v862_v53  ;;  %v133_v57 = vpop.f32.mrf.mxu0 }
  0xb5   :  { %v527_v56 = vadd.f32 %v2398_v20, %v510_v55 }
  0xb7   :  { %v540_v58 = vmax.f32 %v527_v56, 0.0 }
  0xb8   :  { %v359_v59 = vpop.f32.mrf.mxu2  ;;  %v238_v60 = vpop.f32.mrf.mxu1  ;;  %v2418_v62 = vld [vmem:[#allocation2 + $0x10] sm:$0xff] }
  0xb9   :  { %v498_v61 = vmax.f32 %v359_v59, %v467_v54  ;;  %v2420_v63 = vld [vmem:[#allocation2 + $0x9] sm:$0xff]  ;;  %554 = vst.msk [vmem:[#allocation2 + $0x18] sm:$0xff] %vm550_vm2, %v540_v58  ;;  %v269_v2 = vmax.f32 %v130_v44, %v238_v60  ;;  %1914 = vmatmul.msk.f32.gmra.mxu0 %vm550_vm2, %v2418_v62 }
  0xba   :  { %v762_v1 = vld [vmem:[#allocation2 + $0xa] sm:$0xff]  ;;  %1923 = vmatmul.msk.f32.gmra.mxu1 %vm550_vm2, %v2420_v63  ;;  %v470_v4 = vpop.f32.mrf.mxu3 }
  0xbb   :  { %v2427_v3 = vld [vmem:[#allocation2 + $0xf] sm:$0xff]  ;;  %1933 = vmatmul.msk.f32.gmra.mxu2 %vm550_vm2, %v762_v1  ;;  %v511_v6 = vmax.f32 %v269_v2, %v498_v61 }
  0xbc   :  { %1943 = vmatmul.msk.f32.gmra.mxu3 %vm550_vm2, %v2427_v3  ;;  %v136_v16 = vpop.f32.mrf.mxu0  ;;  %v1279_v1 = vld [vmem:[%s3052_s3 + $0xf8] sm:$0xff] }
  0xbd   :  { %v528_v7 = vadd.f32 %v2398_v20, %v511_v6  ;;  %v1077_v2 = vld [vmem:[%s3052_s3 + $0xb8] sm:$0xff]  ;;  %1322 = vmatpush.msra.mxu3 %v1279_v1  ;;  %v1177_v6 = vld [vmem:[%s3052_s3 + $0xd0] sm:$0xff] }
  0xbe   :  { %1120 = vmatpush.msrb.mxu1 %v1077_v2  ;;  %1222 = vmatpush.msrb.mxu2 %v1177_v6 }
  0xbf   :  { %v541_v8 = vmax.f32 %v528_v7, 0.0  ;;  %v1278_v7 = vld [vmem:[%s3052_s3 + $0xf0] sm:$0xff] }
  0xc0   :  { %v362_v9 = vpop.f32.mrf.mxu2  ;;  %v241_v10 = vpop.f32.mrf.mxu1  ;;  %v2436_v13 = vld [vmem:[#allocation2 + $0x18] sm:$0xff]  ;;  %1121 = vmatpush.msrb.mxu1 %v1076_v5  ;;  %1323 = vmatpush.msra.mxu3 %v1278_v7 }
  0xc1   :  { %v499_v11 = vmax.f32 %v362_v9, %v470_v4  ;;  %v2438_v14 = vld [vmem:[#allocation2 + $0x11] sm:$0xff]  ;;  %555 = vst.msk [vmem:[#allocation2 + $0x20] sm:$0xff] %vm550_vm2, %v541_v8  ;;  %v270_v17 = vmax.f32 %v133_v57, %v241_v10  ;;  %1915 = vmatmul.msk.f32.gmra.mxu0 %vm550_vm2, %v2436_v13  ;;  %v1075_v10 = vld [vmem:[%s3052_s3 + $0xa8] sm:$0xff] }
  0xc2   :  { %v763_v15 = vld [vmem:[#allocation2 + $0x12] sm:$0xff]  ;;  %1924 = vmatmul.msk.f32.gmra.mxu1 %vm550_vm2, %v2438_v14  ;;  %v473_v19 = vpop.f32.mrf.mxu3 }
  0xc3   :  { %v2445_v18 = vld [vmem:[#allocation2 + $0x17] sm:$0xff]  ;;  %1934 = vmatmul.msk.f32.gmra.mxu2 %vm550_vm2, %v763_v15  ;;  %v512_v21 = vmax.f32 %v270_v17, %v499_v11  ;;  %v1176_v11 = vld [vmem:[%s3052_s3 + $0xc8] sm:$0xff]  ;;  %1122 = vmatpush.msrb.mxu1 %v1075_v10 }
  0xc4   :  { %1944 = vmatmul.msk.f32.gmra.mxu3 %vm550_vm2, %v2445_v18  ;;  %v139_v34 = vpop.f32.mrf.mxu0  ;;  %v1277_v15 = vld [vmem:[%s3052_s3 + $0xe8] sm:$0xff]  ;;  %1223 = vmatpush.msrb.mxu2 %v1176_v11 }
  0xc5   :  { %v529_v22 = vadd.f32 %v2398_v20, %v512_v21  ;;  %1324 = vmatpush.msra.mxu3 %v1277_v15 }
  0xc6   :  { %1224 = vmatpush.msrb.mxu2 %v1175_v33 }
  0xc7   :  { %v542_v23 = vmax.f32 %v529_v22, 0.0 }
  0xc8   :  { %v365_v24 = vpop.f32.mrf.mxu2  ;;  %v244_v25 = vpop.f32.mrf.mxu1  ;;  %v2451_v27 = vld [vmem:[#allocation2 + $0x20] sm:$0xff] }
  0xc9   :  { %v500_v26 = vmax.f32 %v365_v24, %v473_v19  ;;  %v2453_v28 = vld [vmem:[#allocation2 + $0x19] sm:$0xff]  ;;  %556 = vst.msk [vmem:[#allocation2 + $0x28] sm:$0xff] %vm550_vm2, %v542_v23  ;;  %v271_v30 = vmax.f32 %v136_v16, %v244_v25  ;;  %1916 = vmatmul.msk.f32.gmra.mxu0 %vm550_vm2, %v2451_v27 }
  0xca   :  { %v764_v29 = vld [vmem:[#allocation2 + $0x1a] sm:$0xff]  ;;  %1925 = vmatmul.msk.f32.gmra.mxu1 %vm550_vm2, %v2453_v28  ;;  %v476_v32 = vpop.f32.mrf.mxu3 }
  0xcb   :  { %v2460_v31 = vld [vmem:[#allocation2 + $0x1f] sm:$0xff]  ;;  %1935 = vmatmul.msk.f32.gmra.mxu2 %vm550_vm2, %v764_v29  ;;  %v513_v35 = vmax.f32 %v271_v30, %v500_v26  ;;  %v1380_v30 = vld [vmem:[%s3052_s3 + $0x118] sm:$0xff] }
  0xcc   :  { %1945 = vmatmul.msk.f32.gmra.mxu3 %vm550_vm2, %v2460_v31  ;;  %v142_v50 = vpop.f32.mrf.mxu0  ;;  %1423 = vmatpush.msrb.mxu0 %v1380_v30 }
  0xcd   :  { %v530_v36 = vadd.f32 %v2398_v20, %v513_v35 }
  0xcf   :  { %v543_v37 = vmax.f32 %v530_v36, 0.0 }
  0xd0   :  { %v368_v38 = vpop.f32.mrf.mxu2  ;;  %v247_v39 = vpop.f32.mrf.mxu1  ;;  %v2469_v41 = vld [vmem:[#allocation2 + $0x28] sm:$0xff] }
  0xd1   :  { %v501_v40 = vmax.f32 %v368_v38, %v476_v32  ;;  %v2471_v42 = vld [vmem:[#allocation2 + $0x21] sm:$0xff]  ;;  %557 = vst.msk [vmem:[#allocation2 + $0x30] sm:$0xff] %vm550_vm2, %v543_v37  ;;  %v272_v44 = vmax.f32 %v139_v34, %v247_v39  ;;  %1917 = vmatmul.msk.f32.gmra.mxu0 %vm550_vm2, %v2469_v41  ;;  %v1074_v32 = vld [vmem:[%s3052_s3 + $0xa0] sm:$0xff] }
  0xd2   :  { %v765_v43 = vld [vmem:[#allocation2 + $0x22] sm:$0xff]  ;;  %1926 = vmatmul.msk.f32.gmra.mxu1 %vm550_vm2, %v2471_v42  ;;  %v479_v46 = vpop.f32.mrf.mxu3  ;;  %v1276_v34 = vld [vmem:[%s3052_s3 + $0xe0] sm:$0xff] }
  0xd3   :  { %v2478_v45 = vld [vmem:[#allocation2 + $0x27] sm:$0xff]  ;;  %1936 = vmatmul.msk.f32.gmra.mxu2 %vm550_vm2, %v765_v43  ;;  %v514_v48 = vmax.f32 %v272_v44, %v501_v40  ;;  %1123 = vmatpush.msrb.mxu1 %v1074_v32 }
  0xd4   :  { %1946 = vmatmul.msk.f32.gmra.mxu3 %vm550_vm2, %v2478_v45  ;;  %v145_v9 = vpop.f32.mrf.mxu0 }
  0xd5   :  { %v531_v51 = vadd.f32 %v2398_v20, %v514_v48  ;;  %1325 = vmatpush.msra.mxu3 %v1276_v34 }
  0xd7   :  { %v544_v52 = vmax.f32 %v531_v51, 0.0 }
  0xd8   :  { %v371_v53 = vpop.f32.mrf.mxu2  ;;  %v250_v54 = vpop.f32.mrf.mxu1  ;;  %v2487_v56 = vld [vmem:[#allocation2 + $0x30] sm:$0xff] }
  0xd9   :  { %v502_v55 = vmax.f32 %v371_v53, %v479_v46  ;;  %v2489_v57 = vld [vmem:[#allocation2 + $0x29] sm:$0xff]  ;;  %558 = vst.msk [vmem:[#allocation2 + $0x38] sm:$0xff] %vm550_vm2, %v544_v52  ;;  %v273_v59 = vmax.f32 %v142_v50, %v250_v54  ;;  %1918 = vmatmul.msk.f32.gmra.mxu0 %vm550_vm2, %v2487_v56 }
  0xda   :  { %v766_v58 = vld [vmem:[#allocation2 + $0x2a] sm:$0xff]  ;;  %1927 = vmatmul.msk.f32.gmra.mxu1 %vm550_vm2, %v2489_v57  ;;  %v482_v61 = vpop.f32.mrf.mxu3 }
  0xdb   :  { %v2496_v60 = vld [vmem:[#allocation2 + $0x2f] sm:$0xff]  ;;  %1937 = vmatmul.msk.f32.gmra.mxu2 %vm550_vm2, %v766_v58  ;;  %v515_v4 = vmax.f32 %v273_v59, %v502_v55 }
  0xdc   :  { %1947 = vmatmul.msk.f32.gmra.mxu3 %vm550_vm2, %v2496_v60  ;;  %v1379_v50 = vld [vmem:[%s3052_s3 + $0x110] sm:$0xff] }
  0xdd   :  { %v532_v8 = vadd.f32 %v2398_v20, %v515_v4  ;;  %1424 = vmatpush.msrb.mxu0 %v1379_v50 }
  0xdf   :  { %v545_v16 = vmax.f32 %v532_v8, 0.0 }
  0xe0   :  { %v374_v17 = vpop.f32.mrf.mxu2  ;;  %v253_v19 = vpop.f32.mrf.mxu1  ;;  %v2526_v22 = vld [vmem:[#allocation2 + $0x38] sm:$0xff] }
  0xe1   :  { %v503_v21 = vmax.f32 %v374_v17, %v482_v61  ;;  %v2528_v23 = vld [vmem:[#allocation2 + $0x31] sm:$0xff]  ;;  %559 = vst.msk [vmem:[#allocation2 + $0x40] sm:$0xff] %vm550_vm2, %v545_v16  ;;  %v274_v25 = vmax.f32 %v145_v9, %v253_v19  ;;  %1919 = vmatmul.msk.f32.gmra.mxu0 %vm550_vm2, %v2526_v22 }
  0xe2   :  { %v767_v24 = vld [vmem:[#allocation2 + $0x32] sm:$0xff]  ;;  %1928 = vmatmul.msk.f32.gmra.mxu1 %vm550_vm2, %v2528_v23  ;;  %v485_v29 = vpop.f32.mrf.mxu3 }
  0xe3   :  { %v2535_v26 = vld [vmem:[#allocation2 + $0x37] sm:$0xff]  ;;  %1938 = vmatmul.msk.f32.gmra.mxu2 %vm550_vm2, %v767_v24  ;;  %v516_v35 = vmax.f32 %v274_v25, %v503_v21 }
  0xe4   :  { %1948 = vmatmul.msk.f32.gmra.mxu3 %vm550_vm2, %v2535_v26  ;;  %v1166_v16 = vld [vmem:[#allocation2 + $0x16] sm:$0xff] }
  0xe5   :  { %v533_v36 = vadd.f32 %v2398_v20, %v516_v35 }
  0xe7   :  { %v546_v37 = vmax.f32 %v533_v36, 0.0 }
  0xe8   :  { %v377_v38 = vpop.f32.mrf.mxu2  ;;  %v256_v39 = vpop.f32.mrf.mxu1  ;;  %v2553_v43 = vld [vmem:[#allocation2 + $0x40] sm:$0xff] }
  0xe9   :  { %v504_v40 = vmax.f32 %v377_v38, %v485_v29  ;;  %v2555_v44 = vld [vmem:[#allocation2 + $0x39] sm:$0xff]  ;;  %560 = vst.msk [vmem:[#allocation2 + $0x48] sm:$0xff] %vm550_vm2, %v546_v37  ;;  %v275_v47 = vmax.f32 %v2361_v0, %v256_v39  ;;  %1920 = vmatmul.msk.f32.gmra.mxu0 %vm550_vm2, %v2553_v43 }
  0xea   :  { %v768_v46 = vld [vmem:[#allocation2 + $0x3a] sm:$0xff]  ;;  %1929 = vmatmul.msk.f32.gmra.mxu1 %vm550_vm2, %v2555_v44  ;;  %v488_v52 = vpop.f32.mrf.mxu3 }
  0xeb   :  { %v2563_v48 = vld [vmem:[#allocation2 + $0x3f] sm:$0xff]  ;;  %1939 = vmatmul.msk.f32.gmra.mxu2 %vm550_vm2, %v768_v46  ;;  %v517_v51 = vmax.f32 %v275_v47, %v504_v40 }
  0xec   :  { %1949 = vmatmul.msk.f32.gmra.mxu3 %vm550_vm2, %v2563_v48 }
  0xed   :  { %v534_v0 = vadd.f32 %v2398_v20, %v517_v51 }
  0xef   :  { %v547_v53 = vmax.f32 %v534_v0, 0.0 }
  0xf0   :  { %v380_v54 = vpop.f32.mrf.mxu2  ;;  %v259_v55 = vpop.f32.mrf.mxu1  ;;  %v574_v59 = vld [vmem:[#allocation2 + $0x48] sm:$0x3]  ;;  %v770_v15 = vld [vmem:[#allocation2 + $0x4a] sm:$0x3] }
  0xf1   :  { %v505_v58 = vmax.f32 %v380_v54, %v488_v52  ;;  %v2572_v61 = vld [vmem:[#allocation2 + $0x41] sm:$0xff]  ;;  %561 = vst.msk [vmem:[#allocation2 + $0x50] sm:$0xff] %vm550_vm2, %v547_v53  ;;  %v276_v2 = vmax.f32 %v2390_v12, %v259_v55  ;;  %1921 = vmatmul.msk.f32.gmra.mxu0 %vm550_vm2, %v574_v59  ;;  %v669_v12 = vld [vmem:[#allocation2 + $0x49] sm:$0x3] }
  0xf2   :  { %v769_v1 = vld [vmem:[#allocation2 + $0x42] sm:$0xff]  ;;  %1930 = vmatmul.msk.f32.gmra.mxu1 %vm550_vm2, %v2572_v61  ;;  %v491_v7 = vpop.f32.mrf.mxu3 }
  0xf3   :  { %v2579_v4 = vld [vmem:[#allocation2 + $0x47] sm:$0xff]  ;;  %1940 = vmatmul.msk.f32.gmra.mxu2 %vm550_vm2, %v769_v1  ;;  %v518_v5 = vmax.f32 %v276_v2, %v505_v58 }
  0xf4   :  { %1950 = vmatmul.msk.f32.gmra.mxu3 %vm550_vm2, %v2579_v4  ;;  %v2654_v30 = vld [vmem:[#allocation2 + $0x48] sm:$0xff] }
  0xf5   :  { %v535_v6 = vadd.f32 %v2398_v20, %v518_v5  ;;  %v1165_v20 = vld [vmem:[#allocation2 + $0xe] sm:$0xff]  ;;  %v1172_v32 = vld [vmem:[#allocation2 + $0x46] sm:$0xff] }
  0xf7   :  { %v548_v8 = vmax.f32 %v535_v6, 0.0 }
  0xf8   :  { %v383_v9 = vpop.f32.mrf.mxu2  ;;  %v262_v10 = vpop.f32.mrf.mxu1  ;;  %v871_v11 = vld [vmem:[#allocation2 + $0x4f] sm:$0x3]  ;;  %v1073_v59 = vld [vmem:[#allocation2 + $0x51] sm:$0x3] }
  0xf9   :  { %562 = vst.msk [vmem:[#allocation2 + $0x58] sm:$0xff] %vm550_vm2, %v548_v8  ;;  %1952 = vmatmul.msk.f32.vlgmr.msra.gmra.mxu0 %vm550_vm2, %v2409_v49  ;;  %v1378_v49 = vld [vmem:[%s3052_s3 + $0x108] sm:$0xff]  ;;  %v1072_v46 = vld [vmem:[#allocation2 + $0x49] sm:$0xff] }
  0xfa   :  { %1931 = vmatmul.msk.f32.gmra.mxu1 %vm550_vm2, %v669_v12  ;;  %1425 = vmatpush.msrb.mxu0 %v1378_v49  ;;  %v1173_v47 = vld [vmem:[#allocation2 + $0x4e] sm:$0xff] }
  0xfb   :  { %1941 = vmatmul.msk.f32.gmra.mxu2 %vm550_vm2, %v770_v15 }
  0xfc   :  { %1951 = vmatmul.msk.f32.gmra.mxu3 %vm550_vm2, %v871_v11 }
 0x100   :  { %v1275_v1 = vld [vmem:[#allocation2 + $0x57] sm:$0x3] }
 0x101   :  { %1953 = vmatmul.msk.f32.gmra.mxu0 %vm550_vm2, %v2418_v62 }
 0x102   :  { %1962 = vmatmul.msk.f32.vlgmr.msrb.gmra.mxu1 %vm550_vm2, %v2420_v63  ;;  %v1167_v63 = vld [vmem:[#allocation2 + $0x1e] sm:$0xff] }
 0x103   :  { %1972 = vmatmul.msk.f32.vlgmr.msrb.gmra.mxu2 %vm550_vm2, %v1165_v20 }
 0x104   :  { %1982 = vmatmul.msk.f32.vlgmr.msra.gmra.mxu3 %vm550_vm2, %v2427_v3  ;;  %v1377_v3 = vld [vmem:[%s3052_s3 + $0x100] sm:$0xff] }
 0x105   :  { %1426 = vmatpush.msrb.mxu0 %v1377_v3 }
 0x109   :  { %1954 = vmatmul.msk.f32.gmra.mxu0 %vm550_vm2, %v2436_v13 }
 0x10a   :  { %1963 = vmatmul.msk.f32.gmra.mxu1 %vm550_vm2, %v2438_v14  ;;  %v1168_v14 = vld [vmem:[#allocation2 + $0x26] sm:$0xff] }
 0x10b   :  { %1973 = vmatmul.msk.f32.gmra.mxu2 %vm550_vm2, %v1166_v16 }
 0x10c   :  { %1983 = vmatmul.msk.f32.gmra.mxu3 %vm550_vm2, %v2445_v18  ;;  %v1169_v18 = vld [vmem:[#allocation2 + $0x2e] sm:$0xff] }
 0x111   :  { %1955 = vmatmul.msk.f32.gmra.mxu0 %vm550_vm2, %v2451_v27 }
 0x112   :  { %1964 = vmatmul.msk.f32.gmra.mxu1 %vm550_vm2, %v2453_v28 }
 0x113   :  { %1974 = vmatmul.msk.f32.gmra.mxu2 %vm550_vm2, %v1167_v63 }
 0x114   :  { %1984 = vmatmul.msk.f32.gmra.mxu3 %vm550_vm2, %v2460_v31  ;;  %v1170_v31 = vld [vmem:[#allocation2 + $0x36] sm:$0xff] }
 0x119   :  { %1956 = vmatmul.msk.f32.gmra.mxu0 %vm550_vm2, %v2469_v41 }
 0x11a   :  { %1965 = vmatmul.msk.f32.gmra.mxu1 %vm550_vm2, %v2471_v42  ;;  %v2642_v42 = vld [vmem:[%s3053_s4] ss:$0 sm:$0xff] }
 0x11b   :  { %1975 = vmatmul.msk.f32.gmra.mxu2 %vm550_vm2, %v1168_v14 }
 0x11c   :  { %1985 = vmatmul.msk.f32.gmra.mxu3 %vm550_vm2, %v2478_v45 }
 0x121   :  { %1957 = vmatmul.msk.f32.gmra.mxu0 %vm550_vm2, %v2487_v56 }
 0x122   :  { %1966 = vmatmul.msk.f32.gmra.mxu1 %vm550_vm2, %v2489_v57 }
 0x123   :  { %1976 = vmatmul.msk.f32.gmra.mxu2 %vm550_vm2, %v1169_v18 }
 0x124   :  { %1986 = vmatmul.msk.f32.gmra.mxu3 %vm550_vm2, %v2496_v60  ;;  %v1171_v60 = vld [vmem:[#allocation2 + $0x3e] sm:$0xff] }
 0x126   :  { %v630_v28 = vpop.f32.mrf.mxu0 }
 0x127   :  { %v631_v17 = vadd.f32 %v2642_v42, %v630_v28 }
 0x129   :  { %1958 = vmatmul.msk.f32.gmra.mxu0 %vm550_vm2, %v2526_v22 }
 0x12a   :  { %1967 = vmatmul.msk.f32.gmra.mxu1 %vm550_vm2, %v2528_v23 }
 0x12b   :  { %1977 = vmatmul.msk.f32.gmra.mxu2 %vm550_vm2, %v1170_v31 }
 0x12c   :  { %1987 = vmatmul.msk.f32.gmra.mxu3 %vm550_vm2, %v2535_v26 }
 0x12e   :  { %v633_v45 = vpop.f32.mrf.mxu0 }
 0x12f   :  { %v721_v57 = vpop.f32.mrf.mxu1  ;;  %v634_v33 = vadd.f32 %v2642_v42, %v633_v45 }
 0x130   :  { %v751_v19 = vadd.f32 %v721_v57, %v631_v17 }
 0x131   :  { %1959 = vmatmul.msk.f32.gmra.mxu0 %vm550_vm2, %v2553_v43 }
 0x132   :  { %1968 = vmatmul.msk.f32.gmra.mxu1 %vm550_vm2, %v2555_v44  ;;  %v972_v44 = vld [vmem:[#allocation2 + $0x50] sm:$0x3] }
 0x133   :  { %1978 = vmatmul.msk.f32.gmra.mxu2 %vm550_vm2, %v1171_v60 }
 0x134   :  { %1988 = vmatmul.msk.f32.gmra.mxu3 %vm550_vm2, %v2563_v48  ;;  %v1274_v48 = vld [vmem:[#allocation2 + $0x4f] sm:$0xff] }
 0x136   :  { %v822_v21 = vpop.f32.mrf.mxu2  ;;  %v636_v25 = vpop.f32.mrf.mxu0 }
 0x137   :  { %v923_v23 = vpop.f32.mrf.mxu3  ;;  %v852_v24 = vadd.f32 %v822_v21, %v751_v19  ;;  %v724_v26 = vpop.f32.mrf.mxu1  ;;  %v637_v50 = vadd.f32 %v2642_v42, %v636_v25 }
 0x138   :  { %v752_v34 = vadd.f32 %v724_v26, %v634_v33 }
 0x139   :  { %v2652_v29 = vadd.f32 %v923_v23, %v852_v24  ;;  %1960 = vmatmul.msk.f32.gmra.mxu0 %vm550_vm2, %v2654_v30 }
 0x13a   :  { %1969 = vmatmul.msk.f32.gmra.mxu1 %vm550_vm2, %v2572_v61  ;;  %v1174_v61 = vld [vmem:[#allocation2 + $0x56] sm:$0x3] }
 0x13b   :  { %1979 = vmatmul.msk.f32.gmra.mxu2 %vm550_vm2, %v1172_v32 }
 0x13c   :  { %1989 = vmatmul.msk.f32.gmra.mxu3 %vm550_vm2, %v2579_v4 }
 0x13e   :  { %v825_v35 = vpop.f32.mrf.mxu2  ;;  %v639_v38 = vpop.f32.mrf.mxu0 }
 0x13f   :  { %v926_v36 = vpop.f32.mrf.mxu3  ;;  %v853_v37 = vadd.f32 %v825_v35, %v752_v34  ;;  %v727_v39 = vpop.f32.mrf.mxu1  ;;  %v640_v2 = vadd.f32 %v2642_v42, %v639_v38 }
 0x140   :  { %v753_v51 = vadd.f32 %v727_v39, %v637_v50 }
 0x141   :  { %v2664_v40 = vadd.f32 %v926_v36, %v853_v37  ;;  %1961 = vmatmul.msk.f32.gmra.mxu0 %vm550_vm2, %v972_v44 }
 0x142   :  { %1970 = vmatmul.msk.f32.gmra.mxu1 %vm550_vm2, %v1072_v46 }
 0x143   :  { %1980 = vmatmul.msk.f32.gmra.mxu2 %vm550_vm2, %v1173_v47 }
 0x144   :  { %1990 = vmatmul.msk.f32.gmra.mxu3 %vm550_vm2, %v1274_v48 }
 0x146   :  { %v828_v52 = vpop.f32.mrf.mxu2  ;;  %v642_v54 = vpop.f32.mrf.mxu0 }
 0x147   :  { %v929_v0 = vpop.f32.mrf.mxu3  ;;  %v854_v53 = vadd.f32 %v828_v52, %v753_v51  ;;  %v730_v55 = vpop.f32.mrf.mxu1  ;;  %v643_v12 = vadd.f32 %v2642_v42, %v642_v54 }
 0x148   :  { %v754_v4 = vadd.f32 %v730_v55, %v640_v2  ;;  %v1375_v2 = vld [vmem:[#allocation2 + $0x50] sm:$0xff] }
 0x149   :  { %v2671_v58 = vadd.f32 %v929_v0, %v854_v53  ;;  %1992 = vmatmul.msk.f32.vlgmr.msrb.gmra.mxu0 %vm550_vm2, %v2418_v62 }
 0x14a   :  { %1971 = vmatmul.msk.f32.gmra.mxu1 %vm550_vm2, %v1073_v59 }
 0x14b   :  { %1981 = vmatmul.msk.f32.gmra.mxu2 %vm550_vm2, %v1174_v61 }
 0x14c   :  { %1991 = vmatmul.msk.f32.gmra.mxu3 %vm550_vm2, %v1275_v1 }
 0x14e   :  { %v831_v5 = vpop.f32.mrf.mxu2  ;;  %v645_v8 = vpop.f32.mrf.mxu0 }
 0x14f   :  { %v932_v6 = vpop.f32.mrf.mxu3  ;;  %v855_v7 = vadd.f32 %v831_v5, %v754_v4  ;;  %v733_v9 = vpop.f32.mrf.mxu1  ;;  %v646_v3 = vadd.f32 %v2642_v42, %v645_v8  ;;  %v1376_v5 = vld [vmem:[#allocation2 + $0x58] sm:$0x3] }
 0x150   :  { %v755_v11 = vadd.f32 %v733_v9, %v643_v12 }
 0x151   :  { %v956_v10 = vadd.f32 %v932_v6, %v855_v7  ;;  %1993 = vmatmul.msk.f32.gmra.mxu0 %vm550_vm2, %v2436_v13 }
 0x156   :  { %v834_v62 = vpop.f32.mrf.mxu2  ;;  %v648_v49 = vpop.f32.mrf.mxu0 }
 0x157   :  { %v935_v15 = vpop.f32.mrf.mxu3  ;;  %v856_v20 = vadd.f32 %v834_v62, %v755_v11  ;;  %v736_v16 = vpop.f32.mrf.mxu1  ;;  %v649_v18 = vadd.f32 %v2642_v42, %v648_v49 }
 0x158   :  { %v756_v14 = vadd.f32 %v736_v16, %v646_v3 }
 0x159   :  { %v957_v63 = vadd.f32 %v935_v15, %v856_v20  ;;  %1994 = vmatmul.msk.f32.gmra.mxu0 %vm550_vm2, %v2451_v27 }
 0x15e   :  { %v837_v28 = vpop.f32.mrf.mxu2  ;;  %v651_v45 = vpop.f32.mrf.mxu0 }
 0x15f   :  { %v938_v31 = vpop.f32.mrf.mxu3  ;;  %v857_v13 = vadd.f32 %v837_v28, %v756_v14  ;;  %v739_v57 = vpop.f32.mrf.mxu1  ;;  %v652_v19 = vadd.f32 %v2642_v42, %v651_v45 }
 0x160   :  { %v757_v60 = vadd.f32 %v739_v57, %v649_v18 }
 0x161   :  { %v958_v17 = vadd.f32 %v938_v31, %v857_v13  ;;  %1995 = vmatmul.msk.f32.gmra.mxu0 %vm550_vm2, %v2469_v41 }
 0x166   :  { %v840_v21 = vpop.f32.mrf.mxu2  ;;  %v654_v24 = vpop.f32.mrf.mxu0 }
 0x167   :  { %v941_v23 = vpop.f32.mrf.mxu3  ;;  %v858_v27 = vadd.f32 %v840_v21, %v757_v60  ;;  %v742_v25 = vpop.f32.mrf.mxu1  ;;  %v655_v33 = vadd.f32 %v2642_v42, %v654_v24  ;;  %v2049_v21 = vmov 0.0  }
 0x168   :  { %v758_v26 = vadd.f32 %v742_v25, %v652_v19  ;;  %1554 = vst [vmem:[#allocation5] sm:$0xff] %v2049_v21 }
 0x169   :  { %v959_v32 = vadd.f32 %v941_v23, %v858_v27  ;;  %1996 = vmatmul.msk.f32.gmra.mxu0 %vm550_vm2, %v2487_v56 }
 0x16e   :  { %v843_v34 = vpop.f32.mrf.mxu2  ;;  %v657_v37 = vpop.f32.mrf.mxu0 }
 0x16f   :  { %v944_v35 = vpop.f32.mrf.mxu3  ;;  %v859_v36 = vadd.f32 %v843_v34, %v758_v26  ;;  %v745_v38 = vpop.f32.mrf.mxu1  ;;  %v658_v44 = vadd.f32 %v2642_v42, %v657_v37 }
 0x170   :  { %v759_v41 = vadd.f32 %v745_v38, %v655_v33 }
 0x171   :  { %v960_v39 = vadd.f32 %v944_v35, %v859_v36  ;;  %1997 = vmatmul.msk.f32.gmra.mxu0 %vm550_vm2, %v2526_v22 }
 0x176   :  { %v846_v46 = vpop.f32.mrf.mxu2  ;;  %v1024_v51 = vpop.f32.mrf.mxu0 }
 0x177   :  { %v947_v47 = vpop.f32.mrf.mxu3  ;;  %v860_v48 = vadd.f32 %v846_v46, %v759_v41  ;;  %v748_v50 = vpop.f32.mrf.mxu1  ;;  %v1054_v52 = vadd.f32 %v1024_v51, %v2652_v29  ;;  %v1604_v46 = vld [vmem:[%s3054_s5 + $0xf8] sm:$0xff] }
 0x178   :  { %v760_v56 = vadd.f32 %v748_v50, %v658_v44  ;;  %1671 = vmatpush.msra.mxu2 %v1604_v46  ;;  %v1582_v46 = vld [vmem:[%s3054_s5 + $0x48] sm:$0xff] }
 0x179   :  { %v961_v0 = vadd.f32 %v947_v47, %v860_v48  ;;  %1998 = vmatmul.msk.f32.gmra.mxu0 %vm550_vm2, %v2553_v43  ;;  %v1588_v47 = vld [vmem:[%s3054_s5 + $0x78] sm:$0xff] }
 0x17a   :  { %v1620_v48 = vld [vmem:[%s3054_s5 + $0x178] sm:$0xff]  ;;  %1651 = vmatpush.msra.mxu1 %v1588_v47 }
 0x17b   :  { %1691 = vmatpush.msrb.mxu3 %v1620_v48 }
 0x17e   :  { %v849_v53 = vpop.f32.mrf.mxu2  ;;  %v1027_v55 = vpop.f32.mrf.mxu0 }
 0x17f   :  { %v861_v54 = vadd.f32 %v849_v53, %v760_v56  ;;  %v950_v59 = vpop.f32.mrf.mxu3  ;;  %v1055_v22 = vadd.f32 %v1027_v55, %v2664_v40 }
 0x181   :  { %v962_v61 = vadd.f32 %v950_v59, %v861_v54  ;;  %1999 = vmatmul.msk.f32.gmra.mxu0 %vm550_vm2, %v2654_v30  ;;  %v1125_v30 = vpop.f32.mrf.mxu1  ;;  %v1603_v54 = vld [vmem:[%s3054_s5 + $0xf0] sm:$0xff] }
 0x182   :  { %v1155_v14 = vadd.f32 %v1125_v30, %v1054_v52  ;;  %1672 = vmatpush.msra.mxu2 %v1603_v54 }
 0x186   :  { %v1030_v42 = vpop.f32.mrf.mxu0  ;;  %v1226_v12 = vpop.f32.mrf.mxu2 }
 0x187   :  { %v1056_v1 = vadd.f32 %v1030_v42, %v2671_v58  ;;  %v1327_v62 = vpop.f32.mrf.mxu3  ;;  %v1256_v31 = vadd.f32 %v1226_v12, %v1155_v14 }
 0x189   :  { %2000 = vmatmul.msk.f32.gmra.mxu0 %vm550_vm2, %v1375_v2  ;;  %v1128_v15 = vpop.f32.mrf.mxu1  ;;  %v1357_v13 = vadd.f32 %v1327_v62, %v1256_v31 }
 0x18a   :  { %v1156_v60 = vadd.f32 %v1128_v15, %v1055_v22  ;;  %v1586_v15 = vld [vmem:[%s3054_s5 + $0x68] sm:$0xff] }
 0x18e   :  { %v1033_v29 = vpop.f32.mrf.mxu0 }
 0x18f   :  { %v1057_v4 = vadd.f32 %v1033_v29, %v956_v10  ;;  %v1229_v10 = vpop.f32.mrf.mxu2  ;;  %v1330_v16 = vpop.f32.mrf.mxu3 }
 0x190   :  { %v1257_v23 = vadd.f32 %v1229_v10, %v1156_v60  ;;  %v1618_v10 = vld [vmem:[%s3054_s5 + $0x168] sm:$0xff]  ;;  %v1601_v60 = vld [vmem:[%s3054_s5 + $0xe0] sm:$0xff] }
 0x191   :  { %2001 = vmatmul.msk.f32.gmra.mxu0 %vm550_vm2, %v1376_v5  ;;  %v1587_v5 = vld [vmem:[%s3054_s5 + $0x70] sm:$0xff] }
 0x192   :  { %v1358_v24 = vadd.f32 %v1330_v16, %v1257_v23  ;;  %1652 = vmatpush.msra.mxu1 %v1587_v5 }
 0x194   :  { %1653 = vmatpush.msra.mxu1 %v1586_v15 }
 0x196   :  { %v1036_v43 = vpop.f32.mrf.mxu0 }
 0x197   :  { %v2704_v6 = vadd.f32 %v1036_v43, %v957_v63  ;;  %v1131_v63 = vpop.f32.mrf.mxu1  ;;  %v1232_v28 = vpop.f32.mrf.mxu2  ;;  %v1619_v43 = vld [vmem:[%s3054_s5 + $0x170] sm:$0xff] }
 0x198   :  { %v1333_v45 = vpop.f32.mrf.mxu3  ;;  %v1157_v26 = vadd.f32 %v1131_v63, %v1056_v1  ;;  %1692 = vmatpush.msrb.mxu3 %v1619_v43  ;;  %v1576_v43 = vld [vmem:[%s3054_s5 + $0x18] sm:$0xff] }
 0x19a   :  { %v1258_v34 = vadd.f32 %v1232_v28, %v1157_v26  ;;  %1693 = vmatpush.msrb.mxu3 %v1618_v10 }
 0x19c   :  { %v1359_v37 = vadd.f32 %v1333_v45, %v1258_v34  ;;  %v1616_v34 = vld [vmem:[%s3054_s5 + $0x158] sm:$0xff] }
 0x19e   :  { %v1039_v7 = vpop.f32.mrf.mxu0 }
 0x19f   :  { %v2706_v40 = vadd.f32 %v1039_v7, %v958_v17  ;;  %v1134_v19 = vpop.f32.mrf.mxu1  ;;  %v1235_v27 = vpop.f32.mrf.mxu2  ;;  %v1602_v7 = vld [vmem:[%s3054_s5 + $0xe8] sm:$0xff] }
 0x1a0   :  { %v1336_v33 = vpop.f32.mrf.mxu3  ;;  %1673 = vmatpush.msra.mxu2 %v1602_v7 }
 0x1a2   :  { %1674 = vmatpush.msra.mxu2 %v1601_v60  ;;  %v1634_v60 = vld [vmem:[%s3054_s5 + $0x1e8] sm:$0xff] }
 0x1a6   :  { %v1042_v8 = vpop.f32.mrf.mxu0 }
 0x1a7   :  { %v2708_v9 = vadd.f32 %v1042_v8, %v959_v32  ;;  %v1137_v35 = vpop.f32.mrf.mxu1  ;;  %v1238_v36 = vpop.f32.mrf.mxu2 }
 0x1a8   :  { %v1339_v55 = vpop.f32.mrf.mxu3  ;;  %v1159_v29 = vadd.f32 %v1137_v35, %v2704_v6 }
 0x1aa   :  { %v1260_v6 = vadd.f32 %v1238_v36, %v1159_v29  ;;  %v1583_v36 = vld [vmem:[%s3054_s5 + $0x50] sm:$0xff] }
 0x1ac   :  { %v1361_v63 = vadd.f32 %v1339_v55, %v1260_v6  ;;  %v1614_v6 = vld [vmem:[%s3054_s5 + $0x148] sm:$0xff] }
 0x1ae   :  { %v1045_v58 = vpop.f32.mrf.mxu0 }
 0x1af   :  { %v2710_v11 = vadd.f32 %v1045_v58, %v960_v39  ;;  %v1158_v39 = vadd.f32 %v1134_v19, %v1057_v4  ;;  %v1140_v22 = vpop.f32.mrf.mxu1  ;;  %v1241_v1 = vpop.f32.mrf.mxu2  ;;  %v1617_v19 = vld [vmem:[%s3054_s5 + $0x160] sm:$0xff] }
 0x1b0   :  { %v1342_v16 = vpop.f32.mrf.mxu3  ;;  %v1160_v45 = vadd.f32 %v1140_v22, %v2706_v40  ;;  %1694 = vmatpush.msrb.mxu3 %v1617_v19  ;;  %v1615_v22 = vld [vmem:[%s3054_s5 + $0x150] sm:$0xff] }
 0x1b1   :  { %v1259_v52 = vadd.f32 %v1235_v27, %v1158_v39 }
 0x1b2   :  { %v1261_v40 = vadd.f32 %v1241_v1, %v1160_v45  ;;  %1695 = vmatpush.msrb.mxu3 %v1616_v34  ;;  %v1598_v1 = vld [vmem:[%s3054_s5 + $0xc8] sm:$0xff] }
 0x1b3   :  { %v1594_v34 = vld [vmem:[%s3054_s5 + $0xa8] sm:$0xff] }
 0x1b4   :  { %1696 = vmatpush.msrb.mxu3 %v1615_v22 }
 0x1b6   :  { %v1048_v20 = vpop.f32.mrf.mxu0  ;;  %1697 = vmatpush.msrb.mxu3 %v1614_v6 }
 0x1b7   :  { %v2712_v49 = vadd.f32 %v1048_v20, %v961_v0  ;;  %v1143_v14 = vpop.f32.mrf.mxu1  ;;  %v1244_v21 = vpop.f32.mrf.mxu2 }
 0x1b8   :  { %v1161_v47 = vadd.f32 %v1143_v14, %v2708_v9  ;;  %v1580_v9 = vld [vmem:[%s3054_s5 + $0x38] sm:$0xff] }
 0x1be   :  { %v1051_v3 = vpop.f32.mrf.mxu0 }
 0x1bf   :  { %v2714_v18 = vadd.f32 %v1051_v3, %v962_v61  ;;  %v1360_v61 = vadd.f32 %v1336_v33, %v1259_v52  ;;  %v1584_v33 = vld [vmem:[%s3054_s5 + $0x58] sm:$0xff]  ;;  %v1247_v52 = vpop.f32.mrf.mxu2 }
 0x1c6   :  { %v1428_v57 = vpop.f32.mrf.mxu0 }
 0x1c7   :  { %v1458_v17 = vadd.f32 %v1428_v57, %v1357_v13  ;;  %v1250_v7 = vpop.f32.mrf.mxu2 }
 0x1c9   :  { %1469 = vst.msk [vmem:[#allocation3] sm:$0xff] %vm1468_vm3, %v1458_v17  ;;  %v1585_v17 = vld [vmem:[%s3054_s5 + $0x60] sm:$0xff] }
 0x1ca   :  { %1654 = vmatpush.msra.mxu1 %v1585_v17 }
 0x1cc   :  { %1655 = vmatpush.msra.mxu1 %v1584_v33  ;;  %v1611_v33 = vld [vmem:[%s3054_s5 + $0x130] sm:$0xff] }
 0x1ce   :  { %v1431_v25 = vpop.f32.mrf.mxu0  ;;  %1656 = vmatpush.msra.mxu1 %v1583_v36 }
 0x1cf   :  { %v1459_v32 = vadd.f32 %v1431_v25, %v1358_v24  ;;  %v1253_v45 = vpop.f32.mrf.mxu2 }
 0x1d0   :  { %v1480_v38 = vld [vmem:[#allocation3] sm:$0xff]  ;;  %1657 = vmatpush.msra.mxu1 %v1582_v46 }
 0x1d1   :  { %1470 = vst.msk [vmem:[#allocation3 + $0x8] sm:$0xff] %vm1468_vm3, %v1459_v32  ;;  %v1600_v32 = vld [vmem:[%s3054_s5 + $0xd8] sm:$0xff] }
 0x1d2   :  { %1675 = vmatpush.msra.mxu2 %v1600_v32 }
 0x1d6   :  { %v1434_v41 = vpop.f32.mrf.mxu0 }
 0x1d7   :  { %v1460_v44 = vadd.f32 %v1434_v41, %v1359_v37  ;;  %v1362_v37 = vadd.f32 %v1342_v16, %v1261_v40  ;;  %v1345_v41 = vpop.f32.mrf.mxu3 }
 0x1d8   :  { %v1481_v50 = vld [vmem:[#allocation3 + $0x8] sm:$0xff] }
 0x1d9   :  { %v1489_v51 = vld [vmem:[#allocation3 + $0x1] sm:$0xff]  ;;  %1471 = vst.msk [vmem:[#allocation3 + $0x10] sm:$0xff] %vm1468_vm3, %v1460_v44 }
 0x1da   :  { %v1507_v56 = vld [vmem:[#allocation3 + $0x7] sm:$0xff]  ;;  %v1498_v0 = vmax.f32 %v1480_v38, %v1489_v51  ;;  %v1262_v51 = vadd.f32 %v1244_v21, %v1161_v47 }
 0x1db   :  { %v1518_v53 = vmax.f32 %v1507_v56, %v1481_v50  ;;  %v1581_v56 = vld [vmem:[%s3054_s5 + $0x40] sm:$0xff]  ;;  %v1596_v21 = vld [vmem:[%s3054_s5 + $0xb8] sm:$0xff] }
 0x1dc   :  { %1658 = vmatpush.msra.mxu1 %v1581_v56  ;;  %v1631_v56 = vld [vmem:[%s3054_s5 + $0x1d0] sm:$0xff] }
 0x1dd   :  { %v1527_v59 = vmax.f32 %v1498_v0, %v1518_v53  ;;  %v1363_v0 = vadd.f32 %v1345_v41, %v1262_v51  ;;  %v1579_v53 = vld [vmem:[%s3054_s5 + $0x30] sm:$0xff]  ;;  %v1633_v41 = vld [vmem:[%s3054_s5 + $0x1e0] sm:$0xff] }
 0x1de   :  { %v1437_v2 = vpop.f32.mrf.mxu0  ;;  %1659 = vmatpush.msra.mxu1 %v1580_v9  ;;  %v1591_v9 = vld [vmem:[%s3054_s5 + $0x90] sm:$0xff] }
 0x1df   :  { %v1536_v42 = vmax.f32 %v1527_v59, 0.0  ;;  %v1461_v4 = vadd.f32 %v1437_v2, %v1360_v61  ;;  %v1599_v59 = vld [vmem:[%s3054_s5 + $0xd0] sm:$0xff]  ;;  %v1578_v2 = vld [vmem:[%s3054_s5 + $0x28] sm:$0xff]  ;;  %v1348_v29 = vpop.f32.mrf.mxu3 }
 0x1e0   :  { %v1482_v8 = vld [vmem:[#allocation3 + $0x10] sm:$0xff]  ;;  %1660 = vmatpush.msra.mxu1 %v1579_v53  ;;  %1676 = vmatpush.msra.mxu2 %v1599_v59  ;;  %v1630_v53 = vld [vmem:[%s3054_s5 + $0x1c8] sm:$0xff] }
 0x1e1   :  { %1545 = vst.msk [vmem:[#allocation4] sm:$0xff] %vm1468_vm3, %v1536_v42  ;;  %v1490_v30 = vld [vmem:[#allocation3 + $0x9] sm:$0xff] }
 0x1e2   :  { %v1508_v12 = vld [vmem:[#allocation3 + $0xf] sm:$0xff]  ;;  %v1499_v58 = vmax.f32 %v1481_v50, %v1490_v30  ;;  %1472 = vst.msk [vmem:[#allocation3 + $0x18] sm:$0xff] %vm1468_vm3, %v1461_v4  ;;  %v1146_v50 = vpop.f32.mrf.mxu1  ;;  %1661 = vmatpush.msra.mxu1 %v1578_v2  ;;  %1677 = vmatpush.msra.mxu2 %v1598_v1  ;;  %v1575_v30 = vld [vmem:[%s3054_s5 + $0x10] sm:$0xff]  ;;  %v1606_v1 = vld [vmem:[%s3054_s5 + $0x108] sm:$0xff] }
 0x1e3   :  { %v1519_v62 = vmax.f32 %v1508_v12, %v1482_v8  ;;  %v1162_v61 = vadd.f32 %v1146_v50, %v2710_v11  ;;  %v1577_v11 = vld [vmem:[%s3054_s5 + $0x20] sm:$0xff]  ;;  %v1608_v50 = vld [vmem:[%s3054_s5 + $0x118] sm:$0xff] }
 0x1e4   :  { %1662 = vmatpush.msra.mxu1 %v1577_v11  ;;  %v1629_v2 = vld [vmem:[%s3054_s5 + $0x1c0] sm:$0xff] }
 0x1e5   :  { %v1528_v20 = vmax.f32 %v1499_v58, %v1519_v62  ;;  %v1263_v4 = vadd.f32 %v1247_v52, %v1162_v61  ;;  %v1597_v58 = vld [vmem:[%s3054_s5 + $0xc0] sm:$0xff] }
 0x1e6   :  { %v1440_v13 = vpop.f32.mrf.mxu0  ;;  %1663 = vmatpush.msra.mxu1 %v1576_v43  ;;  %v1613_v62 = vld [vmem:[%s3054_s5 + $0x140] sm:$0xff]  ;;  %1678 = vmatpush.msra.mxu2 %v1597_v58  ;;  %v1626_v58 = vld [vmem:[%s3054_s5 + $0x1a8] sm:$0xff] }
 0x1e7   :  { %v1537_v3 = vmax.f32 %v1528_v20, 0.0  ;;  %v1462_v57 = vadd.f32 %v1440_v13, %v1361_v63  ;;  %v1574_v20 = vld [vmem:[%s3054_s5 + $0x8] sm:$0xff]  ;;  %1698 = vmatpush.msrb.mxu3 %v1613_v62  ;;  %v1351_v14 = vpop.f32.mrf.mxu3  ;;  %v1605_v11 = vld [vmem:[%s3054_s5 + $0x100] sm:$0xff] }
 0x1e8   :  { %v1555_v28 = vld [vmem:[#allocation4] sm:$0x1]  ;;  %v1558_v31 = vld [vmem:[#allocation4 + $0x2] sm:$0x1]  ;;  %1664 = vmatpush.msra.mxu1 %v1575_v30  ;;  %1679 = vmatpush.msra.mxu2 %v1596_v21 }
 0x1e9   :  { %1546 = vst.msk [vmem:[#allocation4 + $0x8] sm:$0xff] %vm1468_vm3, %v1537_v3  ;;  %v1483_v23 = vld [vmem:[#allocation3 + $0x18] sm:$0xff]  ;;  %v1573_v3 = vld [vmem:[%s3054_s5] sm:$0xff] }
 0x1ea   :  { %v1491_v27 = vld [vmem:[#allocation3 + $0x11] sm:$0xff]  ;;  %1557 = vst.msk [vmem:[#allocation5] sm:$0x1] %vm1556_vm4, %v1555_v28  ;;  %v1149_v5 = vpop.f32.mrf.mxu1  ;;  %1665 = vmatpush.msra.mxu1 %v1574_v20 }
 0x1eb   :  { %v1509_v24 = vld [vmem:[#allocation3 + $0x17] sm:$0xff]  ;;  %v1500_v25 = vmax.f32 %v1482_v8, %v1491_v27  ;;  %1473 = vst.msk [vmem:[#allocation3 + $0x20] sm:$0xff] %vm1468_vm3, %v1462_v57  ;;  %v1364_v8 = vadd.f32 %v1348_v29, %v1263_v4  ;;  %v1163_v15 = vadd.f32 %v1149_v5, %v2712_v49  ;;  %v1636_v49 = vld [vmem:[%s3054_s5 + $0x1f8] sm:$0xff]  ;;  %v1595_v27 = vld [vmem:[%s3054_s5 + $0xb0] sm:$0xff] }
 0x1ec   :  { %v1520_v26 = vmax.f32 %v1509_v24, %v1483_v23  ;;  %1559 = vst.msk [vmem:[#allocation5 + $0x2] sm:$0x1] %vm1556_vm4, %v1558_v31  ;;  %1666 = vmatpush.msra.mxu1 %v1573_v3  ;;  %v1635_v31 = vld [vmem:[%s3054_s5 + $0x1f0] sm:$0xff]  ;;  %v1612_v23 = vld [vmem:[%s3054_s5 + $0x138] sm:$0xff]  ;;  %1680 = vmatpush.msra.mxu2 %v1595_v27  ;;  %v1589_v4 = vld [vmem:[%s3054_s5 + $0x80] sm:$0xff] }
 0x1ed   :  { %v1264_v63 = vadd.f32 %v1250_v7, %v1163_v15  ;;  %1699 = vmatpush.msrb.mxu3 %v1612_v23  ;;  %v1628_v5 = vld [vmem:[%s3054_s5 + $0x1b8] sm:$0xff]  ;;  %v1742_v23 = vld [vmem:[%s3056_s7 + $0x50] sm:$0xff]  ;;  %v1741_v27 = vld [vmem:[%s3056_s7 + $0x48] sm:$0xff] }
 0x1ee   :  { %v1529_v35 = vmax.f32 %v1500_v25, %v1520_v26  ;;  %v1443_v44 = vpop.f32.mrf.mxu0  ;;  %1711 = vmatpush.msrb.mxu1 %v1636_v49  ;;  %1681 = vmatpush.msra.mxu2 %v1594_v34  ;;  %v1624_v3 = vld [vmem:[%s3054_s5 + $0x198] sm:$0xff]  ;;  %v1738_v34 = vld [vmem:[%s3056_s7 + $0x30] sm:$0xff] }
 0x1ef   :  { %v1463_v48 = vadd.f32 %v1443_v44, %v1362_v37  ;;  %v1365_v13 = vadd.f32 %v1351_v14, %v1264_v63  ;;  %1700 = vmatpush.msrb.mxu3 %v1611_v33  ;;  %v1593_v37 = vld [vmem:[%s3054_s5 + $0xa0] sm:$0xff]  ;;  %v1632_v44 = vld [vmem:[%s3054_s5 + $0x1d8] sm:$0xff] }
 0x1f0   :  { %v1538_v38 = vmax.f32 %v1529_v35, 0.0  ;;  %v1560_v39 = vld [vmem:[#allocation4 + $0xe] sm:$0x1]  ;;  %1712 = vmatpush.msrb.mxu1 %v1635_v31  ;;  %1682 = vmatpush.msra.mxu2 %v1593_v37  ;;  %v1747_v31 = vld [vmem:[%s3056_s7 + $0x78] sm:$0xff] }
 0x1f1   :  { %1561 = vst.msk [vmem:[#allocation5 + $0x4] sm:$0x1] %vm1556_vm4, %v1560_v39  ;;  %v1610_v35 = vld [vmem:[%s3054_s5 + $0x128] sm:$0xff]  ;;  %v1354_v39 = vpop.f32.mrf.mxu3  ;;  %v1739_v33 = vld [vmem:[%s3056_s7 + $0x38] sm:$0xff] }
 0x1f2   :  { %1547 = vst.msk [vmem:[#allocation4 + $0x10] sm:$0xff] %vm1468_vm3, %v1538_v38  ;;  %v1152_v28 = vpop.f32.mrf.mxu1  ;;  %1713 = vmatpush.msrb.mxu1 %v1634_v60  ;;  %v1609_v38 = vld [vmem:[%s3054_s5 + $0x120] sm:$0xff]  ;;  %1701 = vmatpush.msrb.mxu3 %v1610_v35  ;;  %v1737_v35 = vld [vmem:[%s3056_s7 + $0x28] sm:$0xff]  ;;  %v1735_v37 = vld [vmem:[%s3056_s7 + $0x18] sm:$0xff] }
 0x1f3   :  { %1474 = vst.msk [vmem:[#allocation3 + $0x28] sm:$0xff] %vm1468_vm3, %v1463_v48  ;;  %v1164_v17 = vadd.f32 %v1152_v28, %v2714_v18  ;;  %v1592_v48 = vld [vmem:[%s3054_s5 + $0x98] sm:$0xff]  ;;  %v1623_v28 = vld [vmem:[%s3054_s5 + $0x190] sm:$0xff]  ;;  %v1621_v60 = vld [vmem:[%s3054_s5 + $0x180] sm:$0xff] }
 0x1f4   :  { %1714 = vmatpush.msrb.mxu1 %v1633_v41  ;;  %1702 = vmatpush.msrb.mxu3 %v1609_v38  ;;  %v1734_v38 = vld [vmem:[%s3056_s7 + $0x10] sm:$0xff]  ;;  %v1733_v41 = vld [vmem:[%s3056_s7 + $0x8] sm:$0xff] }
 0x1f5   :  { %v1265_v18 = vadd.f32 %v1253_v45, %v1164_v17  ;;  %1683 = vmatpush.msra.mxu2 %v1592_v48  ;;  %v1622_v45 = vld [vmem:[%s3054_s5 + $0x188] sm:$0xff]  ;;  %v1744_v17 = vld [vmem:[%s3056_s7 + $0x60] sm:$0xff] }
 0x1f6   :  { %v1446_v55 = vpop.f32.mrf.mxu0  ;;  %1715 = vmatpush.msrb.mxu1 %v1632_v44  ;;  %1703 = vmatpush.msrb.mxu3 %v1608_v50  ;;  %v1788_v44 = vld [vmem:[%s3058_s9 + $0x78] sm:$0xff]  ;;  %v1785_v48 = vld [vmem:[%s3058_s9 + $0x60] sm:$0xff] }
 0x1f7   :  { %v1464_v42 = vadd.f32 %v1446_v55, %v1363_v0  ;;  %v1366_v46 = vadd.f32 %v1354_v39, %v1265_v18  ;;  %v1607_v0 = vld [vmem:[%s3054_s5 + $0x110] sm:$0xff]  ;;  %1684 = vmatpush.msra.mxu2 %v1591_v9  ;;  %v1732_v39 = vld [vmem:[%s3056_s7] sm:$0xff]  ;;  %v1784_v50 = vld [vmem:[%s3058_s9 + $0x58] sm:$0xff] }
 0x1f8   :  { %1716 = vmatpush.msrb.mxu1 %v1631_v56  ;;  %1704 = vmatpush.msrb.mxu3 %v1607_v0  ;;  %v1782_v56 = vld [vmem:[%s3058_s9 + $0x48] sm:$0xff]  ;;  %v1780_v9 = vld [vmem:[%s3058_s9 + $0x38] sm:$0xff]  ;;  %v1779_v0 = vld [vmem:[%s3058_s9 + $0x30] sm:$0xff] }
 0x1f9   :  { %v1562_v54 = vld [vmem:[#allocation4 + $0x10] sm:$0x1]  ;;  %1475 = vst.msk [vmem:[#allocation3 + $0x30] sm:$0xff] %vm1468_vm3, %v1464_v42  ;;  %v1590_v42 = vld [vmem:[%s3054_s5 + $0x88] sm:$0xff] }
 0x1fa   :  { %1563 = vst.msk [vmem:[#allocation5 + $0x6] sm:$0x1] %vm1556_vm4, %v1562_v54  ;;  %1717 = vmatpush.msrb.mxu1 %v1630_v53  ;;  %1685 = vmatpush.msra.mxu2 %v1590_v42 }
 0x1fb   :  { %1705 = vmatpush.msrb.mxu3 %v1606_v1 }
 0x1fc   :  { %1718 = vmatpush.msrb.mxu1 %v1629_v2  ;;  %1686 = vmatpush.msra.mxu2 %v1589_v4 }
 0x1fd   :  { %1706 = vmatpush.msrb.mxu3 %v1605_v11 }
 0x1fe   :  { %v1449_v12 = vpop.f32.mrf.mxu0  ;;  %1719 = vmatpush.msrb.mxu1 %v1628_v5  ;;  %1752 = vmatpush.msrb.mxu2 %v1747_v31 }
 0x1ff   :  { %v1465_v10 = vadd.f32 %v1449_v12, %v1364_v8  ;;  %v1627_v8 = vld [vmem:[%s3054_s5 + $0x1b0] sm:$0xff]  ;;  %1793 = vmatpush.msra.mxu3 %v1788_v44 }
 0x200   :  { %v1486_v16 = vld [vmem:[#allocation3 + $0x30] sm:$0xff]  ;;  %1720 = vmatpush.msrb.mxu1 %v1627_v8 }
 0x201   :  { %1476 = vst.msk [vmem:[#allocation3 + $0x38] sm:$0xff] %vm1468_vm3, %v1465_v10  ;;  %v1773_v8 = vld [vmem:[%s3058_s9] sm:$0xff] }
 0x202   :  { %1721 = vmatpush.msrb.mxu1 %v1626_v58 }
 0x206   :  { %v1452_v57 = vpop.f32.mrf.mxu0 }
 0x207   :  { %v1466_v19 = vadd.f32 %v1452_v57, %v1365_v13  ;;  %v1746_v13 = vld [vmem:[%s3056_s7 + $0x70] sm:$0xff]  ;;  %v1745_v57 = vld [vmem:[%s3056_s7 + $0x68] sm:$0xff] }
 0x208   :  { %v1487_v24 = vld [vmem:[#allocation3 + $0x38] sm:$0xff]  ;;  %1753 = vmatpush.msrb.mxu2 %v1746_v13 }
 0x209   :  { %v1495_v40 = vld [vmem:[#allocation3 + $0x31] sm:$0xff]  ;;  %1477 = vst.msk [vmem:[#allocation3 + $0x40] sm:$0xff] %vm1468_vm3, %v1466_v19  ;;  %v1743_v19 = vld [vmem:[%s3056_s7 + $0x58] sm:$0xff] }
 0x20a   :  { %v1513_v25 = vld [vmem:[#allocation3 + $0x37] sm:$0xff]  ;;  %v1504_v26 = vmax.f32 %v1486_v16, %v1495_v40  ;;  %1754 = vmatpush.msrb.mxu2 %v1745_v57 }
 0x20b   :  { %v1524_v32 = vmax.f32 %v1513_v25, %v1487_v24  ;;  %v1625_v16 = vld [vmem:[%s3054_s5 + $0x1a0] sm:$0xff] }
 0x20c   :  { %1722 = vmatpush.msrb.mxu1 %v1625_v16  ;;  %1755 = vmatpush.msrb.mxu2 %v1744_v17 }
 0x20d   :  { %v1533_v36 = vmax.f32 %v1504_v26, %v1524_v32 }
 0x20e   :  { %v1455_v51 = vpop.f32.mrf.mxu0  ;;  %1723 = vmatpush.msrb.mxu1 %v1624_v3  ;;  %1756 = vmatpush.msrb.mxu2 %v1743_v19 }
 0x20f   :  { %v1542_v47 = vmax.f32 %v1533_v36, 0.0  ;;  %v1467_v52 = vadd.f32 %v1455_v51, %v1366_v46  ;;  %v1736_v36 = vld [vmem:[%s3056_s7 + $0x20] sm:$0xff]  ;;  %v1787_v46 = vld [vmem:[%s3058_s9 + $0x70] sm:$0xff] }
 0x210   :  { %v1496_v54 = vld [vmem:[#allocation3 + $0x39] sm:$0xff]  ;;  %v1497_v6 = vld [vmem:[#allocation3 + $0x41] sm:$0x3]  ;;  %1724 = vmatpush.msrb.mxu1 %v1623_v28  ;;  %1757 = vmatpush.msrb.mxu2 %v1742_v23 }
 0x211   :  { %1551 = vst.msk [vmem:[#allocation4 + $0x30] sm:$0xff] %vm1468_vm3, %v1542_v47  ;;  %v1514_v55 = vld [vmem:[#allocation3 + $0x3f] sm:$0xff]  ;;  %v1505_v22 = vmax.f32 %v1487_v24, %v1496_v54  ;;  %v1740_v24 = vld [vmem:[%s3056_s7 + $0x40] sm:$0xff]  ;;  %1794 = vmatpush.msra.mxu3 %v1787_v46 }
 0x212   :  { %v1516_v59 = vld [vmem:[#allocation3 + $0x40] sm:$0xff]  ;;  %1479 = vst.msk [vmem:[#allocation3 + $0x48] sm:$0x3] %vm1478_vm5, %v1467_v52  ;;  %1725 = vmatpush.msrb.mxu1 %v1622_v45  ;;  %1758 = vmatpush.msrb.mxu2 %v1741_v27  ;;  %v1786_v47 = vld [vmem:[%s3058_s9 + $0x68] sm:$0xff]  ;;  %v1781_v52 = vld [vmem:[%s3058_s9 + $0x40] sm:$0xff] }
 0x213   :  { %v1525_v61 = vmax.f32 %v1514_v55, %v1516_v59  ;;  %v1488_v7 = vld [vmem:[#allocation3 + $0x40] sm:$0x3]  ;;  %1795 = vmatpush.msra.mxu3 %v1786_v47  ;;  %v2016_v54 = vld [vmem:[%s3055_s6] ss:$0 sm:$0xff]  ;;  %v1778_v55 = vld [vmem:[%s3058_s9 + $0x28] sm:$0xff] }
 0x214   :  { %v1506_v10 = vmax.f32 %v1488_v7, %v1497_v6  ;;  %1726 = vmatpush.msrb.mxu1 %v1621_v60  ;;  %1759 = vmatpush.msrb.mxu2 %v1740_v24  ;;  %v1783_v51 = vld [vmem:[%s3058_s9 + $0x50] sm:$0xff]  ;;  %v1777_v59 = vld [vmem:[%s3058_s9 + $0x20] sm:$0xff]  ;;  %v1774_v7 = vld [vmem:[%s3058_s9 + $0x8] sm:$0xff] }
 0x215   :  { %v1534_v29 = vmax.f32 %v1505_v22, %v1525_v61  ;;  %1796 = vmatpush.msra.mxu3 %v1785_v48  ;;  %v1776_v61 = vld [vmem:[%s3058_s9 + $0x18] sm:$0xff] }
 0x216   :  { %1760 = vmatpush.msrb.mxu2 %v1739_v33 }
 0x217   :  { %v1543_v43 = vmax.f32 %v1534_v29, 0.0  ;;  %1797 = vmatpush.msra.mxu3 %v1784_v50 }
 0x218   :  { %v1564_v30 = vld [vmem:[#allocation4 + $0x31] sm:$0x1]  ;;  %v1566_v12 = vld [vmem:[#allocation4 + $0x33] sm:$0x1]  ;;  %1761 = vmatpush.msrb.mxu2 %v1738_v34 }
 0x219   :  { %1552 = vst.msk [vmem:[#allocation4 + $0x38] sm:$0xff] %vm1468_vm3, %v1543_v43  ;;  %v1515_v62 = vld [vmem:[#allocation3 + $0x47] sm:$0x3]  ;;  %1798 = vmatpush.msra.mxu3 %v1783_v51 }
 0x21a   :  { %v1517_v15 = vld [vmem:[#allocation3 + $0x48] sm:$0x3]  ;;  %1565 = vst.msk [vmem:[#allocation5 + $0x1] sm:$0x1] %vm1556_vm4, %v1564_v30  ;;  %1762 = vmatpush.msrb.mxu2 %v1737_v35  ;;  %v1775_v43 = vld [vmem:[%s3058_s9 + $0x10] sm:$0xff] }
 0x21b   :  { %v1526_v20 = vmax.f32 %v1515_v62, %v1517_v15  ;;  %1567 = vst.msk [vmem:[#allocation5 + $0x3] sm:$0x1] %vm1556_vm4, %v1566_v12  ;;  %1799 = vmatpush.msra.mxu3 %v1782_v56  ;;  %v2017_v30 = vld [vmem:[%s3057_s8] ss:$0 sm:$0xff]  ;;  %s2050_s8 = smov [#allocation6]  }
 0x21c   :  { %1763 = vmatpush.msrb.mxu2 %v1736_v36  ;;  %v2018_v62 = vld [vmem:[%s3059_s10] ss:$0 sm:$0xff]  ;;  %s1845_s9 = sshll.u32 %s2050_s8, 4  ;;  %s1846_s9 = int_to_ptr.vmem [resolvable:$true] %s1845_s9 }
 0x21d   :  { %v1535_v63 = vmax.f32 %v1506_v10, %v1526_v20  ;;  %1800 = vmatpush.msra.mxu3 %v1781_v52 }
 0x21e   :  { %1764 = vmatpush.msrb.mxu2 %v1735_v37 }
 0x21f   :  { %v1544_v14 = vmax.f32 %v1535_v63, 0.0  ;;  %1801 = vmatpush.msra.mxu3 %v1780_v9 }
 0x220   :  { %v1568_v49 = vld [vmem:[#allocation4 + $0x3f] sm:$0x1]  ;;  %1765 = vmatpush.msrb.mxu2 %v1734_v38 }
 0x221   :  { %1553 = vst.msk [vmem:[#allocation4 + $0x40] sm:$0x3] %vm1478_vm5, %v1544_v14  ;;  %1802 = vmatpush.msra.mxu3 %v1779_v0 }
 0x222   :  { %1569 = vst.msk [vmem:[#allocation5 + $0x5] sm:$0x1] %vm1556_vm4, %v1568_v49  ;;  %1766 = vmatpush.msrb.mxu2 %v1733_v41 }
 0x223   :  { %1803 = vmatpush.msra.mxu3 %v1778_v55 }
 0x224   :  { %1767 = vmatpush.msrb.mxu2 %v1732_v39 }
 0x225   :  { %1804 = vmatpush.msra.mxu3 %v1777_v59 }
 0x227   :  { %1805 = vmatpush.msra.mxu3 %v1776_v61 }
 0x228   :  { %v1570_v21 = vld [vmem:[#allocation4 + $0x41] sm:$0x1] }
 0x229   :  { %1571 = vst.msk [vmem:[#allocation5 + $0x7] sm:$0x1] %vm1556_vm4, %v1570_v21  ;;  %1806 = vmatpush.msra.mxu3 %v1775_v43 }
 0x22b   :  { %1807 = vmatpush.msra.mxu3 %v1774_v7 }
 0x22d   :  { %1808 = vmatpush.msra.mxu3 %v1773_v8 }
 0x230   :  { %v1572_v40 = vld [vmem:[#allocation5] sm:$0xff] }
 0x231   :  { %1642 = vst [vmem:[#allocation1] ss:$4 sm:$0xff] %v1572_v40 }
 0x238   :  { %v1643_v25 = vld.sshfl [vmem:[#allocation1] sm:$0xff pattern:$0x73625140]  ;;  %v1644_v18 = vld.sshfl [vmem:[#allocation1 + $0x8] sm:$0xff pattern:$0x73625140] }
 0x239   :  { %1667 = vmatmul.f32.vlgmr.msra.gmra.mxu1 %v1643_v25  ;;  %1687 = vmatmul.f32.vlgmr.msra.gmra.mxu2 %v1644_v18  ;;  %v1645_v26 = vld.sshfl [vmem:[#allocation1 + $0x10] sm:$0xff pattern:$0x73625140]  ;;  %v1646_v32 = vld.sshfl [vmem:[#allocation1 + $0x18] sm:$0xff pattern:$0x73625140] }
 0x23a   :  { %1707 = vmatmul.f32.vlgmr.msrb.gmra.mxu3 %v1645_v26 }
 0x241   :  { %1727 = vmatmul.f32.vlgmr.msrb.gmra.mxu1 %v1646_v32 }
 0x2b6   :  { %v1668_v53 = vpop.f32.mrf.mxu1 }
 0x2b7   :  { %v1669_v22 = vadd.f32 %v2016_v54, %v1668_v53 }
 0x2bc   :  { %v1688_v42 = vpop.f32.mrf.mxu2 }
 0x2bd   :  { %v1689_v1 = vadd.f32 %v1688_v42, %v1669_v22  ;;  %v1708_v2 = vpop.f32.mrf.mxu3 }
 0x2be   :  { %v1728_v4 = vpop.f32.mrf.mxu1 }
 0x2bf   :  { %v1709_v29 = vadd.f32 %v1708_v2, %v1689_v1 }
 0x2c1   :  { %v1729_v11 = vadd.f32 %v1728_v4, %v1709_v29 }
 0x2c3   :  { %v1731_v5 = vmax.f32 %v1729_v11, 0.0 }
 0x2c5   :  { %1768 = vmatmul.f32.vlgmr.msrb.gmra.mxu2 %v1731_v5 }
 0x348   :  { %v1769_v12 = vpop.f32.mrf.mxu2 }
 0x349   :  { %v1770_v6 = vadd.f32 %v2017_v30, %v1769_v12 }
 0x34b   :  { %v1772_v58 = vmax.f32 %v1770_v6, 0.0 }
 0x34d   :  { %1809 = vmatmul.f32.vlgmr.msra.gmra.mxu3 %v1772_v58 }
 0x3d0   :  { %v1810_v15 = vpop.f32.mrf.mxu3 }
 0x3d1   :  { %v1811_v10 = vadd.f32 %v2018_v62, %v1810_v15 }
 0x3d3   :  { %v1813_v20 = vmax.f32 %v1811_v10, 0.0 }
 0x3d5   :  { %v1815_v16 = vsel %vm1814_vm6, %v1813_v20, -inf }
 0x3d6   :  { %1816 = vmax.xlane.f32.xlu0 %v1815_v16 }
 0x449   :  { %v1817_v63 = vpop.xlane.xlu0 %1816 }
 0x44a   :  { %v1818_v3 = vsub.f32 %v1813_v20, %v1817_v63 }
 0x44c   :  { %v1819_v14 = vmul.f32 1.442695, %v1818_v3 }
 0x44e   :  { %2019 = vpow2.f32 %v1819_v14 }
 0x454   :  { %v2020_v49 = vpop.eup %2019 }
 0x455   :  { %v1821_v28 = vsel %vm1814_vm6, %v2020_v49, 0.0 }
 0x456   :  { %1822 = vadd.xlane.f32.xlu0 %v1821_v28 }
 0x4c9   :  { %v1823_v31 = vpop.xlane.xlu0 %1822 }
 0x4ca   :  { %2021 = vrcp.f32 %v1823_v31  ;;  %v1835_v60 = vand.u32 2147483648, %v1823_v31  ;;  %v1833_v19 = vand.u32 2147483647, %v1823_v31  ;;  %vm1829_vm8 = vweird.f32 %v1823_v31 }
 0x4cc   :  { %v1836_v23 = vor.u32 1.1754944e-38, %v1835_v60  ;;  %vm1834_vm10 = vcmp.eq.f32.partialorder %v1833_v19, 8.507059e+37 }
 0x4d0   :  { %v2022_v13 = vpop.eup %2021 }
 0x4d1   :  { %v1825_v45 = vmul.f32 %v2022_v13, %v1823_v31  ;;  %vm1830_vm7 = vweird.f32 %v2022_v13 }
 0x4d2   :  { %vm1831_vm9 = vmor %vm1829_vm8, %vm1830_vm7 }
 0x4d3   :  { %v1826_v57 = vsub.f32 1.0, %v1825_v45 }
 0x4d5   :  { %v1827_v17 = vmul.f32 %v2022_v13, %v1826_v57 }
 0x4d7   :  { %v1828_v21 = vadd.f32 %v2022_v13, %v1827_v17 }
 0x4d9   :  { %v1832_v27 = vsel %vm1831_vm9, %v2022_v13, %v1828_v21 }
 0x4da   :  { %v1837_v24 = vsel %vm1834_vm10, %v1836_v23, %v1832_v27 }
 0x4db   :  { %v1838_v40 = vmul.f32 %v2020_v49, %v1837_v24 }
 0x4dd   :  { %1839 = vst.msk [vmem:[#allocation6] sm:$0x3] %vm1814_vm6, %v1838_v40 }
 0x4de   :  { %1850 = dma.vmem_to_hbm [thread:$0]  %s1846_s9, 32, %s1848_s21, [#allocation7]  }
 0x4df   :  { %2047 = dma.done.wait [#allocation7], 32  }
 0x4e0   :  { %2048 = vsyncadd [#allocation7], 4294967264 }
 0x4e1   :  { %1855 = vsyncpa [#allocation7], 1 }

</bundles_post_ra>
